<compile_context>
chip_gen: v7x
topology: tpu7x:2x2x1
jax: 0.10.0
libtpu: 0.0.40
codegen_flags: <defaults>
</compile_context>

<pallas_src>
import jax
import jax.numpy as jnp
from jax.experimental import pallas as pl
from jax.experimental.pallas import tpu as pltpu

EPS = 1e-5


def _fused_kernel(x_ref, g_ref, w_ref, gb_ref, o_ref):
    # x_ref  : [Cin, P]     f32  (NCHW input, N==1, flattened spatial)
    # g_ref  : [1, Cin]     f32  (pre-sigmoid SE logits)
    # w_ref  : [Cblk, Cin]  f32  (1x1 conv weight, Cout block)
    # gb_ref : [Cblk, 2]    f32  (packed [gamma, beta])
    # o_ref  : [Cblk, P]    f32
    gate = jax.nn.sigmoid(g_ref[...])                       # [1, Cin]   (EUP)
    # Fold the SE gate into the small weight:  (x*g) @ W^T == (W*g) @ x.
    # bf16 matmul inputs with f32 accumulation -> native MXU rate.
    wg = (w_ref[...] * gate).astype(jnp.bfloat16)           # [Cblk, Cin]
    xb = x_ref[...].astype(jnp.bfloat16)                    # [Cin, P]

    # Stage y through the output ref so the BN epilogue streams it from VMEM
    # instead of holding the whole [Cblk, P] f32 tile live in vregs.
    o_ref[...] = jnp.dot(wg, xb, preferred_element_type=jnp.float32)

    # BatchNorm2d (training): biased batch stats over (N, H, W) == the P axis.
    # Single pass via sum / sum-of-squares (fine for this data regime; a
    # two-pass variance would be more robust for |mean| >> std activations).
    y = o_ref[...]
    inv_p = 1.0 / y.shape[1]
    s1 = jnp.sum(y, axis=1, keepdims=True)                  # [Cblk, 1]
    s2 = jnp.sum(y * y, axis=1, keepdims=True)              # [Cblk, 1]
    mean = s1 * inv_p
    var = s2 * inv_p - mean * mean
    gamma = gb_ref[:, 0:1]                                  # [Cblk, 1]
    beta = gb_ref[:, 1:2]                                   # [Cblk, 1]
    scale = jax.lax.rsqrt(var + EPS) * gamma                # [Cblk, 1]
    bias = beta - mean * scale                              # fold mean into bias
    o_ref[...] = o_ref[...] * scale + bias                  # one FMA pass over y


def _num_cout_blocks():
    # v7x has 2 TensorCores per chip -> split Cout across them.  On 1-TC
    # v5e/v6e a grid only adds per-step pipeline overhead, so stay single-shot.
    try:
        kind = jax.devices()[0].device_kind.lower()
        if "7" in kind:
            return 2
    except Exception:
        pass
    return 1


def fused_se_conv_bn(x_nchw, se_nc11, weight_oi11, gamma, beta, cout_blocks=None):
    """x_nchw: [N, Cin, H, W], se_nc11: [N, Cin, 1, 1] (N must be 1),
    weight_oi11: [Cout, Cin, 1, 1], gamma/beta: [Cout]."""
    N, Cin, H, W = x_nchw.shape
    Cout = weight_oi11.shape[0]
    assert N == 1, "SE-gate-into-weight folding assumes a per-sample gate (N == 1)"
    P = N * H * W

    if cout_blocks is None:
        cout_blocks = _num_cout_blocks()
    if Cout % cout_blocks != 0 or (Cout // cout_blocks) % 8 != 0:
        cout_blocks = 1
    cblk = Cout // cout_blocks

    # Zero-copy (row-major contiguous) reshapes only; no transposes.
    x2d = x_nchw.reshape(Cin, P)                 # [Cin, P]
    g2d = se_nc11.reshape(1, Cin)                # [1, Cin]
    w2d = weight_oi11.reshape(Cout, Cin)         # [Cout, Cin]
    gb2d = jnp.stack([gamma, beta], axis=1)      # [Cout, 2] packed side input

    flops = 2 * Cout * Cin * P
    bytes_accessed = 4 * (Cin * P + Cout * Cin + Cout * P + Cin + 2 * Cout)
    ce = pl.CostEstimate(flops=flops, transcendentals=Cin,
                         bytes_accessed=bytes_accessed)
    out_shape = jax.ShapeDtypeStruct((Cout, P), jnp.float32)

    if cout_blocks == 1:
        # Single shot, whole problem (<2 MiB) resident in VMEM, no pipeline.
        vmem = pl.BlockSpec(memory_space=pltpu.MemorySpace.VMEM)
        out2d = pl.pallas_call(
            _fused_kernel,
            out_shape=out_shape,
            in_specs=[vmem, vmem, vmem, vmem],
            out_specs=vmem,
            cost_estimate=ce,
        )(x2d, g2d, w2d, gb2d)
    else:
        # v7x: split Cout across the 2 TensorCores; BN stats are per-channel,
        # so each block is fully independent.
        out2d = pl.pallas_call(
            _fused_kernel,
            out_shape=out_shape,
            grid=(cout_blocks,),
            in_specs=[
                pl.BlockSpec((Cin, P), lambda i: (0, 0)),
                pl.BlockSpec((1, Cin), lambda i: (0, 0)),
                pl.BlockSpec((cblk, Cin), lambda i: (i, 0)),
                pl.BlockSpec((cblk, 2), lambda i: (i, 0)),
            ],
            out_specs=pl.BlockSpec((cblk, P), lambda i: (i, 0)),
            compiler_params=pltpu.CompilerParams(
                dimension_semantics=("parallel",)),
            cost_estimate=ce,
        )(x2d, g2d, w2d, gb2d)

    # [Cout, P] -> [N, Cout, H, W]   (zero-copy)
    return out2d.reshape(N, Cout, H, W)


def _reference(x_nchw, se_nc11, weight_oi11, gamma, beta):
    gate = jax.nn.sigmoid(se_nc11)
    xg = x_nchw * gate
    y = jnp.einsum("nchw,oc->nohw", xg,
                   weight_oi11.reshape(weight_oi11.shape[0], -1))
    mean = jnp.mean(y, axis=(0, 2, 3), keepdims=True)
    var = jnp.mean((y - mean) ** 2, axis=(0, 2, 3), keepdims=True)
    return (y - mean) * jax.lax.rsqrt(var + EPS) * gamma.reshape(1, -1, 1, 1) \
        + beta.reshape(1, -1, 1, 1)


if __name__ == "__main__":
    key = jax.random.PRNGKey(0)
    k1, k2, k3, k4, k5 = jax.random.split(key, 5)

    N, Cin, H, W, Cout = 1, 864, 14, 14, 144

    x329 = jax.random.normal(k1, (N, Cin, H, W), dtype=jnp.float32)
    x333 = jax.random.normal(k2, (N, Cin, 1, 1), dtype=jnp.float32)
    weight = jax.random.normal(k3, (Cout, Cin, 1, 1), dtype=jnp.float32) * 0.02
    gamma = jax.random.normal(k4, (Cout,), dtype=jnp.float32) * 0.1 + 1.0
    beta = jax.random.normal(k5, (Cout,), dtype=jnp.float32) * 0.1

    out = fused_se_conv_bn(x329, x333, weight, gamma, beta)
    out = jax.block_until_ready(out)

    ref = _reference(x329, x333, weight, gamma, beta)
    assert out.shape == (N, Cout, H, W)
    # bf16 matmul inputs (f32 accumulation) -> loosened tolerance vs fp32 ref.
    assert jnp.allclose(out, ref, atol=5e-2, rtol=5e-2), \
        f"max abs err {jnp.max(jnp.abs(out - ref))}"

    print("KERNEL_OK")
</pallas_src>

<mosaic_0001>
module attributes {stable_mosaic.version = 11 : i64} {
  func.func @_fused_kernel(%arg0: memref<864x196xf32, #tpu.memory_space<vmem>>, %arg1: memref<1x864xf32, #tpu.memory_space<vmem>>, %arg2: memref<144x864xf32, #tpu.memory_space<vmem>>, %arg3: memref<144x2xf32, #tpu.memory_space<vmem>>, %arg4: memref<144x196xf32, #tpu.memory_space<vmem>>) attributes {dimension_semantics = [], scalar_prefetch = 0 : i64, scratch_operands = 0 : i64, tpu.core_type = #tpu.core_type<tc>} {
    %c0 = arith.constant 0 : index
    %c0_0 = arith.constant 0 : index
    %0 = vector.load %arg1[%c0, %c0_0] : memref<1x864xf32, #tpu.memory_space<vmem>>, vector<1x864xf32>
    %1 = arith.negf %0 : vector<1x864xf32>
    %2 = math.exp %1 : vector<1x864xf32>
    %cst = arith.constant 1.000000e+00 : f32
    %3 = vector.broadcast %cst : f32 to vector<1x864xf32>
    %4 = arith.addf %3, %2 : vector<1x864xf32>
    %5 = arith.divf %3, %4 : vector<1x864xf32>
    %c0_1 = arith.constant 0 : index
    %c0_2 = arith.constant 0 : index
    %6 = vector.load %arg2[%c0_1, %c0_2] : memref<144x864xf32, #tpu.memory_space<vmem>>, vector<144x864xf32>
    %7 = vector.broadcast %5 : vector<1x864xf32> to vector<144x864xf32>
    %8 = arith.mulf %6, %7 : vector<144x864xf32>
    %9 = arith.truncf %8 : vector<144x864xf32> to vector<144x864xbf16>
    %c0_3 = arith.constant 0 : index
    %c0_4 = arith.constant 0 : index
    %10 = vector.load %arg0[%c0_3, %c0_4] : memref<864x196xf32, #tpu.memory_space<vmem>>, vector<864x196xf32>
    %11 = arith.truncf %10 : vector<864x196xf32> to vector<864x196xbf16>
    %cst_5 = arith.constant dense<0.000000e+00> : vector<144x196xf32>
    %12 = tpu.matmul %9, %11, %cst_5 {dimension_numbers = #tpu.dot_dimension_numbers<[1], [0], [0], [1], [0, 0, 1, 1], [], []>} : vector<144x864xbf16>, vector<864x196xbf16>, vector<144x196xf32> -> vector<144x196xf32>
    %c0_6 = arith.constant 0 : index
    %c0_7 = arith.constant 0 : index
    %13 = vector.load %arg4[%c0_6, %c0_7] : memref<144x196xf32, #tpu.memory_space<vmem>>, vector<144x196xf32>
    tpu.vector_store %arg4[%c0_6, %c0_7], %12 {strides = array<i32>} : memref<144x196xf32, #tpu.memory_space<vmem>>, vector<144x196xf32>,
    %c0_8 = arith.constant 0 : index
    %c0_9 = arith.constant 0 : index
    %14 = vector.load %arg4[%c0_8, %c0_9] : memref<144x196xf32, #tpu.memory_space<vmem>>, vector<144x196xf32>
    %cst_10 = arith.constant dense<0.000000e+00> : vector<144xf32>
    %15 = vector.multi_reduction <add>, %14, %cst_10 [1] : vector<144x196xf32> to vector<144xf32>
    %16 = vector.shape_cast %15 : vector<144xf32> to vector<144x1xf32>
    %17 = arith.mulf %14, %14 : vector<144x196xf32>
    %cst_11 = arith.constant dense<0.000000e+00> : vector<144xf32>
    %18 = vector.multi_reduction <add>, %17, %cst_11 [1] : vector<144x196xf32> to vector<144xf32>
    %19 = vector.shape_cast %18 : vector<144xf32> to vector<144x1xf32>
    %cst_12 = arith.constant 0.00510204071 : f32
    %20 = vector.broadcast %cst_12 : f32 to vector<144x1xf32>
    %21 = arith.mulf %16, %20 : vector<144x1xf32>
    %cst_13 = arith.constant 0.00510204071 : f32
    %22 = vector.broadcast %cst_13 : f32 to vector<144x1xf32>
    %23 = arith.mulf %19, %22 : vector<144x1xf32>
    %24 = arith.mulf %21, %21 : vector<144x1xf32>
    %25 = arith.subf %23, %24 : vector<144x1xf32>
    %c0_14 = arith.constant 0 : index
    %c0_15 = arith.constant 0 : index
    %26 = vector.load %arg3[%c0_14, %c0_15] : memref<144x2xf32, #tpu.memory_space<vmem>>, vector<144x1xf32>
    %c0_16 = arith.constant 0 : index
    %c1 = arith.constant 1 : index
    %27 = vector.load %arg3[%c0_16, %c1] : memref<144x2xf32, #tpu.memory_space<vmem>>, vector<144x1xf32>
    %cst_17 = arith.constant 9.99999974E-6 : f32
    %28 = vector.broadcast %cst_17 : f32 to vector<144x1xf32>
    %29 = arith.addf %25, %28 : vector<144x1xf32>
    %30 = math.rsqrt %29 : vector<144x1xf32>
    %31 = arith.mulf %30, %26 : vector<144x1xf32>
    %32 = arith.mulf %21, %31 : vector<144x1xf32>
    %33 = arith.subf %27, %32 : vector<144x1xf32>
    %c0_18 = arith.constant 0 : index
    %c0_19 = arith.constant 0 : index
    %34 = vector.load %arg4[%c0_18, %c0_19] : memref<144x196xf32, #tpu.memory_space<vmem>>, vector<144x196xf32>
    %35 = vector.broadcast %31 : vector<144x1xf32> to vector<144x196xf32>
    %36 = arith.mulf %34, %35 : vector<144x196xf32>
    %37 = vector.broadcast %33 : vector<144x1xf32> to vector<144x196xf32>
    %38 = arith.addf %36, %37 : vector<144x196xf32>
    %c0_20 = arith.constant 0 : index
    %c0_21 = arith.constant 0 : index
    %39 = vector.load %arg4[%c0_20, %c0_21] : memref<144x196xf32, #tpu.memory_space<vmem>>, vector<144x196xf32>
    tpu.vector_store %arg4[%c0_20, %c0_21], %38 {strides = array<i32>} : memref<144x196xf32, #tpu.memory_space<vmem>>, vector<144x196xf32>,
    return
  }
}

</mosaic_0001>

<bundles_post_ra>
// kernel: tpu_custom_call.1
= control target key start
LH: loop header
LB: loop body
LE: loop exit
PB: predicated region body
PF: predicated region fallthrough
CT: control target
= control target key end

     0   :  { %v2231_v60 = vmov 0   ;;  %s4028_s0 = inlined_call_operand.vmem [shape: f32[864,196], index: 0, kind: input, shape index: {}]   ;;  %s4029_s1 = inlined_call_operand.vmem [shape: f32[1,864], index: 1, kind: input, shape index: {}]   ;;  %s4030_s2 = inlined_call_operand.vmem [shape: f32[144,864], index: 2, kind: input, shape index: {}]   ;;  %s4031_s3 = inlined_call_operand.vmem [shape: f32[144,2], index: 3, kind: input, shape index: {}]   ;;  %s4032_s4 = inlined_call_operand.hbm [shape: f32[144,196], index: 4, kind: output, shape index: {}]  }
   0x1   :  { %v378_v0 = vld [vmem:[%s4028_s0 + $0x8] sm:$0xff]  ;;  %v380_v1 = vld [vmem:[%s4028_s0 + $0x18] sm:$0xff]  ;;  %v377_v5 = vld [vmem:[%s4028_s0] sm:$0xff]  ;;  %2155 = vset.pattern.permute.xlu1 %v2231_v60  ;;  %2154 = vset.pattern.permute.xlu0 %v2231_v60 }
   0x2   :  { %v506_v2 = vld [vmem:[%s4028_s0 + $0x408] sm:$0xff]  ;;  %v594_v3 = vpack.c.bf16 %v380_v1, %v378_v0  ;;  %v508_v4 = vld [vmem:[%s4028_s0 + $0x418] sm:$0xff]  ;;  %v379_v6 = vld [vmem:[%s4028_s0 + $0x10] sm:$0xff] }
   0x3   :  { %v658_v7 = vpack.c.bf16 %v508_v4, %v506_v2  ;;  %v593_v8 = vpack.c.bf16 %v379_v6, %v377_v5  ;;  %v505_v9 = vld [vmem:[%s4028_s0 + $0x400] sm:$0xff]  ;;  %v507_v10 = vld [vmem:[%s4028_s0 + $0x410] sm:$0xff]  ;;  %v382_v11 = vld [vmem:[%s4028_s0 + $0x28] sm:$0xff] }
   0x4   :  { %729 = vmatprep.subr.bf16.mxu1 %v594_v3  ;;  %v657_v12 = vpack.c.bf16 %v507_v10, %v505_v9  ;;  %v384_v13 = vld [vmem:[%s4028_s0 + $0x38] sm:$0xff]  ;;  %v510_v14 = vld [vmem:[%s4028_s0 + $0x428] sm:$0xff]  ;;  %v381_v18 = vld [vmem:[%s4028_s0 + $0x20] sm:$0xff] }
   0x5   :  { %v512_v15 = vld [vmem:[%s4028_s0 + $0x438] sm:$0xff]  ;;  %975 = vmatprep.subr.bf16.mxu0 %v658_v7  ;;  %730 = vmatpush1.bf16.msra.mxu1 %v593_v8  ;;  %v596_v16 = vpack.c.bf16 %v384_v13, %v382_v11  ;;  %v383_v19 = vld [vmem:[%s4028_s0 + $0x30] sm:$0xff]  ;;  %v509_v20 = vld [vmem:[%s4028_s0 + $0x420] sm:$0xff] }
   0x6   :  { %v660_v17 = vpack.c.bf16 %v512_v15, %v510_v14  ;;  %976 = vmatpush1.bf16.msra.mxu0 %v657_v12  ;;  %v595_v21 = vpack.c.bf16 %v383_v19, %v381_v18  ;;  %v511_v22 = vld [vmem:[%s4028_s0 + $0x430] sm:$0xff]  ;;  %v386_v23 = vld [vmem:[%s4028_s0 + $0x48] sm:$0xff]  ;;  %v388_v24 = vld [vmem:[%s4028_s0 + $0x58] sm:$0xff] }
   0x7   :  { %731 = vmatprep.subr.bf16.mxu1 %v596_v16  ;;  %v659_v25 = vpack.c.bf16 %v511_v22, %v509_v20  ;;  %v598_v26 = vpack.c.bf16 %v388_v24, %v386_v23  ;;  %v514_v27 = vld [vmem:[%s4028_s0 + $0x448] sm:$0xff]  ;;  %v516_v28 = vld [vmem:[%s4028_s0 + $0x458] sm:$0xff]  ;;  %v385_v29 = vld [vmem:[%s4028_s0 + $0x40] sm:$0xff] }
   0x8   :  { %977 = vmatprep.subr.bf16.mxu0 %v660_v17  ;;  %v662_v30 = vpack.c.bf16 %v516_v28, %v514_v27  ;;  %v387_v31 = vld [vmem:[%s4028_s0 + $0x50] sm:$0xff]  ;;  %v513_v32 = vld [vmem:[%s4028_s0 + $0x440] sm:$0xff]  ;;  %v390_v35 = vld [vmem:[%s4028_s0 + $0x68] sm:$0xff] }
   0x9   :  { %v515_v33 = vld [vmem:[%s4028_s0 + $0x450] sm:$0xff]  ;;  %732 = vmatpush1.bf16.msra.mxu1 %v595_v21  ;;  %v597_v34 = vpack.c.bf16 %v387_v31, %v385_v29  ;;  %v392_v36 = vld [vmem:[%s4028_s0 + $0x78] sm:$0xff]  ;;  %v518_v37 = vld [vmem:[%s4028_s0 + $0x468] sm:$0xff] }
   0xa   :  { %978 = vmatpush1.bf16.msra.mxu0 %v659_v25  ;;  %733 = vmatprep.subr.bf16.mxu1 %v598_v26  ;;  %v661_v38 = vpack.c.bf16 %v515_v33, %v513_v32  ;;  %v600_v39 = vpack.c.bf16 %v392_v36, %v390_v35  ;;  %v520_v40 = vld [vmem:[%s4028_s0 + $0x478] sm:$0xff]  ;;  %v389_v41 = vld [vmem:[%s4028_s0 + $0x60] sm:$0xff]  ;;  %v391_v42 = vld [vmem:[%s4028_s0 + $0x70] sm:$0xff] }
   0xb   :  { %979 = vmatprep.subr.bf16.mxu0 %v662_v30  ;;  %v664_v43 = vpack.c.bf16 %v520_v40, %v518_v37  ;;  %v517_v44 = vld [vmem:[%s4028_s0 + $0x460] sm:$0xff]  ;;  %v519_v45 = vld [vmem:[%s4028_s0 + $0x470] sm:$0xff]  ;;  %v394_v46 = vld [vmem:[%s4028_s0 + $0x88] sm:$0xff]  ;;  %v599_v50 = vpack.c.bf16 %v391_v42, %v389_v41 }
   0xc   :  { %v396_v47 = vld [vmem:[%s4028_s0 + $0x98] sm:$0xff]  ;;  %v522_v48 = vld [vmem:[%s4028_s0 + $0x488] sm:$0xff]  ;;  %v663_v51 = vpack.c.bf16 %v519_v45, %v517_v44  ;;  %v393_v53 = vld [vmem:[%s4028_s0 + $0x80] sm:$0xff] }
   0xd   :  { %v524_v49 = vld [vmem:[%s4028_s0 + $0x498] sm:$0xff]  ;;  %734 = vmatpush1.bf16.msra.mxu1 %v597_v34  ;;  %v602_v52 = vpack.c.bf16 %v396_v47, %v394_v46  ;;  %v395_v54 = vld [vmem:[%s4028_s0 + $0x90] sm:$0xff]  ;;  %v521_v55 = vld [vmem:[%s4028_s0 + $0x480] sm:$0xff] }
   0xe   :  { %980 = vmatpush1.bf16.msra.mxu0 %v661_v38  ;;  %735 = vmatprep.subr.bf16.mxu1 %v600_v39  ;;  %v666_v56 = vpack.c.bf16 %v524_v49, %v522_v48  ;;  %v523_v57 = vld [vmem:[%s4028_s0 + $0x490] sm:$0xff]  ;;  %v398_v58 = vld [vmem:[%s4028_s0 + $0xa8] sm:$0xff]  ;;  %v400_v59 = vld [vmem:[%s4028_s0 + $0xb8] sm:$0xff]  ;;  %v601_v63 = vpack.c.bf16 %v395_v54, %v393_v53 }
   0xf   :  { %981 = vmatprep.subr.bf16.mxu0 %v664_v43  ;;  %v526_v61 = vld [vmem:[%s4028_s0 + $0x4a8] sm:$0xff]  ;;  %v528_v62 = vld [vmem:[%s4028_s0 + $0x4b8] sm:$0xff]  ;;  %v665_v0 = vpack.c.bf16 %v523_v57, %v521_v55  ;;  %v604_v1 = vpack.c.bf16 %v400_v59, %v398_v58  ;;  %v397_v2 = vld [vmem:[%s4028_s0 + $0xa0] sm:$0xff] }
  0x10   :  { %v399_v3 = vld [vmem:[%s4028_s0 + $0xb0] sm:$0xff]  ;;  %v525_v4 = vld [vmem:[%s4028_s0 + $0x4a0] sm:$0xff]  ;;  %v668_v5 = vpack.c.bf16 %v528_v62, %v526_v61  ;;  %v402_v7 = vld [vmem:[%s4028_s0 + $0xc8] sm:$0xff] }
  0x11   :  { %736 = vmatpush1.bf16.msra.mxu1 %v599_v50  ;;  %v527_v6 = vld [vmem:[%s4028_s0 + $0x4b0] sm:$0xff]  ;;  %v404_v8 = vld [vmem:[%s4028_s0 + $0xd8] sm:$0xff]  ;;  %v530_v9 = vld [vmem:[%s4028_s0 + $0x4c8] sm:$0xff]  ;;  %v603_v11 = vpack.c.bf16 %v399_v3, %v397_v2 }
  0x12   :  { %982 = vmatpush1.bf16.msra.mxu0 %v663_v51  ;;  %737 = vmatprep.subr.bf16.mxu1 %v602_v52  ;;  %v532_v10 = vld [vmem:[%s4028_s0 + $0x4d8] sm:$0xff]  ;;  %v667_v12 = vpack.c.bf16 %v527_v6, %v525_v4  ;;  %v606_v13 = vpack.c.bf16 %v404_v8, %v402_v7  ;;  %v401_v14 = vld [vmem:[%s4028_s0 + $0xc0] sm:$0xff]  ;;  %v403_v15 = vld [vmem:[%s4028_s0 + $0xd0] sm:$0xff] }
  0x13   :  { %983 = vmatprep.subr.bf16.mxu0 %v666_v56  ;;  %v529_v16 = vld [vmem:[%s4028_s0 + $0x4c0] sm:$0xff]  ;;  %v670_v17 = vpack.c.bf16 %v532_v10, %v530_v9  ;;  %v531_v18 = vld [vmem:[%s4028_s0 + $0x4d0] sm:$0xff]  ;;  %v406_v19 = vld [vmem:[%s4028_s0 + $0xe8] sm:$0xff]  ;;  %v605_v23 = vpack.c.bf16 %v403_v15, %v401_v14 }
  0x14   :  { %v408_v20 = vld [vmem:[%s4028_s0 + $0xf8] sm:$0xff]  ;;  %v534_v21 = vld [vmem:[%s4028_s0 + $0x4e8] sm:$0xff]  ;;  %v669_v24 = vpack.c.bf16 %v531_v18, %v529_v16  ;;  %v405_v26 = vld [vmem:[%s4028_s0 + $0xe0] sm:$0xff] }
  0x15   :  { %738 = vmatpush1.bf16.msra.mxu1 %v601_v63  ;;  %v536_v22 = vld [vmem:[%s4028_s0 + $0x4f8] sm:$0xff]  ;;  %v608_v25 = vpack.c.bf16 %v408_v20, %v406_v19  ;;  %v407_v27 = vld [vmem:[%s4028_s0 + $0xf0] sm:$0xff]  ;;  %v533_v28 = vld [vmem:[%s4028_s0 + $0x4e0] sm:$0xff] }
  0x16   :  { %984 = vmatpush1.bf16.msra.mxu0 %v665_v0  ;;  %739 = vmatprep.subr.bf16.mxu1 %v604_v1  ;;  %v672_v29 = vpack.c.bf16 %v536_v22, %v534_v21  ;;  %v535_v30 = vld [vmem:[%s4028_s0 + $0x4f0] sm:$0xff]  ;;  %v410_v31 = vld [vmem:[%s4028_s0 + $0x108] sm:$0xff]  ;;  %v412_v32 = vld [vmem:[%s4028_s0 + $0x118] sm:$0xff]  ;;  %v607_v35 = vpack.c.bf16 %v407_v27, %v405_v26 }
  0x17   :  { %985 = vmatprep.subr.bf16.mxu0 %v668_v5  ;;  %v538_v33 = vld [vmem:[%s4028_s0 + $0x508] sm:$0xff]  ;;  %v540_v34 = vld [vmem:[%s4028_s0 + $0x518] sm:$0xff]  ;;  %v671_v36 = vpack.c.bf16 %v535_v30, %v533_v28  ;;  %v610_v37 = vpack.c.bf16 %v412_v32, %v410_v31  ;;  %v409_v38 = vld [vmem:[%s4028_s0 + $0x100] sm:$0xff] }
  0x18   :  { %v411_v39 = vld [vmem:[%s4028_s0 + $0x110] sm:$0xff]  ;;  %v537_v40 = vld [vmem:[%s4028_s0 + $0x500] sm:$0xff]  ;;  %v674_v41 = vpack.c.bf16 %v540_v34, %v538_v33  ;;  %v414_v43 = vld [vmem:[%s4028_s0 + $0x128] sm:$0xff] }
  0x19   :  { %740 = vmatpush1.bf16.msra.mxu1 %v603_v11  ;;  %v539_v42 = vld [vmem:[%s4028_s0 + $0x510] sm:$0xff]  ;;  %v416_v44 = vld [vmem:[%s4028_s0 + $0x138] sm:$0xff]  ;;  %v542_v45 = vld [vmem:[%s4028_s0 + $0x528] sm:$0xff]  ;;  %v609_v47 = vpack.c.bf16 %v411_v39, %v409_v38 }
  0x1a   :  { %986 = vmatpush1.bf16.msra.mxu0 %v667_v12  ;;  %741 = vmatprep.subr.bf16.mxu1 %v606_v13  ;;  %v544_v46 = vld [vmem:[%s4028_s0 + $0x538] sm:$0xff]  ;;  %v673_v48 = vpack.c.bf16 %v539_v42, %v537_v40  ;;  %v612_v49 = vpack.c.bf16 %v416_v44, %v414_v43  ;;  %v413_v50 = vld [vmem:[%s4028_s0 + $0x120] sm:$0xff]  ;;  %v415_v51 = vld [vmem:[%s4028_s0 + $0x130] sm:$0xff] }
  0x1b   :  { %987 = vmatprep.subr.bf16.mxu0 %v670_v17  ;;  %v541_v52 = vld [vmem:[%s4028_s0 + $0x520] sm:$0xff]  ;;  %v676_v53 = vpack.c.bf16 %v544_v46, %v542_v45  ;;  %v543_v54 = vld [vmem:[%s4028_s0 + $0x530] sm:$0xff]  ;;  %v418_v55 = vld [vmem:[%s4028_s0 + $0x148] sm:$0xff]  ;;  %v611_v59 = vpack.c.bf16 %v415_v51, %v413_v50 }
  0x1c   :  { %v420_v56 = vld [vmem:[%s4028_s0 + $0x158] sm:$0xff]  ;;  %v546_v57 = vld [vmem:[%s4028_s0 + $0x548] sm:$0xff]  ;;  %v675_v61 = vpack.c.bf16 %v543_v54, %v541_v52  ;;  %v417_v63 = vld [vmem:[%s4028_s0 + $0x140] sm:$0xff] }
  0x1d   :  { %742 = vmatpush1.bf16.msra.mxu1 %v605_v23  ;;  %v548_v58 = vld [vmem:[%s4028_s0 + $0x558] sm:$0xff]  ;;  %v614_v62 = vpack.c.bf16 %v420_v56, %v418_v55  ;;  %v419_v0 = vld [vmem:[%s4028_s0 + $0x150] sm:$0xff]  ;;  %v545_v1 = vld [vmem:[%s4028_s0 + $0x540] sm:$0xff] }
  0x1e   :  { %988 = vmatpush1.bf16.msra.mxu0 %v669_v24  ;;  %743 = vmatprep.subr.bf16.mxu1 %v608_v25  ;;  %v678_v2 = vpack.c.bf16 %v548_v58, %v546_v57  ;;  %v547_v3 = vld [vmem:[%s4028_s0 + $0x550] sm:$0xff]  ;;  %v422_v4 = vld [vmem:[%s4028_s0 + $0x168] sm:$0xff]  ;;  %v424_v5 = vld [vmem:[%s4028_s0 + $0x178] sm:$0xff]  ;;  %v613_v8 = vpack.c.bf16 %v419_v0, %v417_v63 }
  0x1f   :  { %989 = vmatprep.subr.bf16.mxu0 %v672_v29  ;;  %v550_v6 = vld [vmem:[%s4028_s0 + $0x568] sm:$0xff]  ;;  %v552_v7 = vld [vmem:[%s4028_s0 + $0x578] sm:$0xff]  ;;  %v421_v9 = vld [vmem:[%s4028_s0 + $0x160] sm:$0xff]  ;;  %v677_v10 = vpack.c.bf16 %v547_v3, %v545_v1  ;;  %v616_v11 = vpack.c.bf16 %v424_v5, %v422_v4 }
  0x20   :  { %v423_v12 = vld [vmem:[%s4028_s0 + $0x170] sm:$0xff]  ;;  %v549_v13 = vld [vmem:[%s4028_s0 + $0x560] sm:$0xff]  ;;  %v680_v15 = vpack.c.bf16 %v552_v7, %v550_v6  ;;  %v426_v16 = vld [vmem:[%s4028_s0 + $0x188] sm:$0xff] }
  0x21   :  { %744 = vmatpush1.bf16.msra.mxu1 %v607_v35  ;;  %v551_v14 = vld [vmem:[%s4028_s0 + $0x570] sm:$0xff]  ;;  %v428_v17 = vld [vmem:[%s4028_s0 + $0x198] sm:$0xff]  ;;  %v19_v18 = vld [vmem:[%s4029_s1] sm:$0x7f]  ;;  %v615_v22 = vpack.c.bf16 %v423_v12, %v421_v9 }
  0x22   :  { %990 = vmatpush1.bf16.msra.mxu0 %v671_v36  ;;  %745 = vmatprep.subr.bf16.mxu1 %v610_v37  ;;  %v554_v19 = vld [vmem:[%s4028_s0 + $0x588] sm:$0xff]  ;;  %v556_v20 = vld [vmem:[%s4028_s0 + $0x598] sm:$0xff]  ;;  %v2030_v21 = vmul.f32 -1.442695, %v19_v18  ;;  %v679_v23 = vpack.c.bf16 %v551_v14, %v549_v13  ;;  %v618_v24 = vpack.c.bf16 %v428_v17, %v426_v16  ;;  %v425_v25 = vld [vmem:[%s4028_s0 + $0x180] sm:$0xff] }
  0x23   :  { %991 = vmatprep.subr.bf16.mxu0 %v674_v41  ;;  %v427_v26 = vld [vmem:[%s4028_s0 + $0x190] sm:$0xff]  ;;  %v553_v27 = vld [vmem:[%s4028_s0 + $0x580] sm:$0xff]  ;;  %v682_v28 = vpack.c.bf16 %v556_v20, %v554_v19  ;;  %v430_v30 = vld [vmem:[%s4028_s0 + $0x1a8] sm:$0xff] }
  0x24   :  { %2158 = vpow2.f32 %v2030_v21  ;;  %v555_v29 = vld [vmem:[%s4028_s0 + $0x590] sm:$0xff]  ;;  %v432_v31 = vld [vmem:[%s4028_s0 + $0x1b8] sm:$0xff]  ;;  %v558_v32 = vld [vmem:[%s4028_s0 + $0x5a8] sm:$0xff]  ;;  %v617_v34 = vpack.c.bf16 %v427_v26, %v425_v25 }
  0x25   :  { %746 = vmatpush1.bf16.msra.mxu1 %v609_v47  ;;  %v560_v33 = vld [vmem:[%s4028_s0 + $0x5b8] sm:$0xff]  ;;  %v681_v35 = vpack.c.bf16 %v555_v29, %v553_v27  ;;  %v620_v36 = vpack.c.bf16 %v432_v31, %v430_v30  ;;  %v429_v37 = vld [vmem:[%s4028_s0 + $0x1a0] sm:$0xff]  ;;  %v431_v38 = vld [vmem:[%s4028_s0 + $0x1b0] sm:$0xff] }
  0x26   :  { %992 = vmatpush1.bf16.msra.mxu0 %v673_v48  ;;  %747 = vmatprep.subr.bf16.mxu1 %v612_v49  ;;  %v557_v39 = vld [vmem:[%s4028_s0 + $0x5a0] sm:$0xff]  ;;  %v684_v40 = vpack.c.bf16 %v560_v33, %v558_v32  ;;  %v559_v41 = vld [vmem:[%s4028_s0 + $0x5b0] sm:$0xff]  ;;  %v434_v42 = vld [vmem:[%s4028_s0 + $0x1c8] sm:$0xff]  ;;  %v619_v46 = vpack.c.bf16 %v431_v38, %v429_v37 }
  0x27   :  { %993 = vmatprep.subr.bf16.mxu0 %v676_v53  ;;  %v436_v43 = vld [vmem:[%s4028_s0 + $0x1d8] sm:$0xff]  ;;  %v562_v44 = vld [vmem:[%s4028_s0 + $0x5c8] sm:$0xff]  ;;  %v683_v47 = vpack.c.bf16 %v559_v41, %v557_v39  ;;  %v433_v49 = vld [vmem:[%s4028_s0 + $0x1c0] sm:$0xff] }
  0x28   :  { %v564_v45 = vld [vmem:[%s4028_s0 + $0x5d8] sm:$0xff]  ;;  %v622_v48 = vpack.c.bf16 %v436_v43, %v434_v42  ;;  %v435_v50 = vld [vmem:[%s4028_s0 + $0x1d0] sm:$0xff]  ;;  %v561_v51 = vld [vmem:[%s4028_s0 + $0x5c0] sm:$0xff] }
  0x29   :  { %748 = vmatpush1.bf16.msra.mxu1 %v611_v59  ;;  %v686_v52 = vpack.c.bf16 %v564_v45, %v562_v44  ;;  %v563_v53 = vld [vmem:[%s4028_s0 + $0x5d0] sm:$0xff]  ;;  %v438_v54 = vld [vmem:[%s4028_s0 + $0x1e8] sm:$0xff]  ;;  %v440_v55 = vld [vmem:[%s4028_s0 + $0x1f8] sm:$0xff]  ;;  %v621_v59 = vpack.c.bf16 %v435_v50, %v433_v49 }
  0x2a   :  { %994 = vmatpush1.bf16.msra.mxu0 %v675_v61  ;;  %749 = vmatprep.subr.bf16.mxu1 %v614_v62  ;;  %v566_v57 = vld [vmem:[%s4028_s0 + $0x5e8] sm:$0xff]  ;;  %v568_v58 = vld [vmem:[%s4028_s0 + $0x5f8] sm:$0xff]  ;;  %v153_v62 = vlaneseq  ;;  %v685_v63 = vpack.c.bf16 %v563_v53, %v561_v51  ;;  %v624_v0 = vpack.c.bf16 %v440_v55, %v438_v54  ;;  %v437_v1 = vld [vmem:[%s4028_s0 + $0x1e0] sm:$0xff] }
  0x2b   :  { %995 = vmatprep.subr.bf16.mxu0 %v678_v2  ;;  %v439_v2 = vld [vmem:[%s4028_s0 + $0x1f0] sm:$0xff]  ;;  %v565_v3 = vld [vmem:[%s4028_s0 + $0x5e0] sm:$0xff]  ;;  %v688_v4 = vpack.c.bf16 %v568_v58, %v566_v57  ;;  %v442_v6 = vld [vmem:[%s4028_s0 + $0x208] sm:$0xff] }
  0x2c   :  { %v567_v5 = vld [vmem:[%s4028_s0 + $0x5f0] sm:$0xff]  ;;  %v444_v7 = vld [vmem:[%s4028_s0 + $0x218] sm:$0xff]  ;;  %v2676_v18 = vld [vmem:[%s4028_s0 + $0x600] sm:$0xff] }
  0x2d   :  { %750 = vmatpush1.bf16.msra.mxu1 %v613_v8  ;;  %v570_v8 = vld [vmem:[%s4028_s0 + $0x608] sm:$0xff]  ;;  %v572_v9 = vld [vmem:[%s4028_s0 + $0x618] sm:$0xff]  ;;  %v687_v12 = vpack.c.bf16 %v567_v5, %v565_v3  ;;  %v626_v13 = vpack.c.bf16 %v444_v7, %v442_v6  ;;  %v2671_v16 = vld [vmem:[%s4028_s0 + $0x210] sm:$0xff] }
  0x2e   :  { %996 = vmatpush1.bf16.msra.mxu0 %v677_v10  ;;  %751 = vmatprep.subr.bf16.mxu1 %v616_v11  ;;  %v2159_v56 = vpop.eup %2158  ;;  %v623_v10 = vpack.c.bf16 %v439_v2, %v437_v1  ;;  %v154_v11 = vshrl.u32 %v153_v62, 7  ;;  %v690_v14 = vpack.c.bf16 %v572_v9, %v570_v8  ;;  %v2681_v19 = vld [vmem:[%s4028_s0 + $0x610] sm:$0xff]  ;;  %v2686_v20 = vld [vmem:[%s4028_s0 + $0x228] sm:$0xff]  ;;  %v2696_v25 = vld [vmem:[%s4028_s0 + $0x220] sm:$0xff] }
  0x2f   :  { %997 = vmatprep.subr.bf16.mxu0 %v680_v15  ;;  %v23_v61 = vadd.f32 1.0, %v2159_v56  ;;  %v2666_v15 = vld [vmem:[%s4028_s0 + $0x200] sm:$0xff]  ;;  %v2701_v26 = vld [vmem:[%s4028_s0 + $0x230] sm:$0xff]  ;;  %v27_v27 = vld [vmem:[%s4030_s2 + $0x8] sm:$0xff]  ;;  %v689_v39 = vpack.c.bf16 %v2681_v19, %v2676_v18 }
  0x30   :  { %v159_v17 = vsub.s32 1, %v154_v11  ;;  %v175_v21 = vsub.s32 5, %v154_v11  ;;  %v163_v29 = vsub.s32 2, %v154_v11  ;;  %v179_v30 = vsub.s32 6, %v154_v11  ;;  %v34_v31 = vld [vmem:[%s4030_s2 + $0x40] sm:$0xff]  ;;  %v2712_v32 = vld [vmem:[%s4028_s0 + $0x628] sm:$0xff] }
  0x31   :  { %752 = vmatpush1.bf16.msra.mxu1 %v615_v22  ;;  %2160 = vrcp.f32 %v23_v61  ;;  %v155_v22 = vsub.s32 0, %v154_v11  ;;  %v2717_v33 = vld [vmem:[%s4028_s0 + $0x638] sm:$0xff]  ;;  %v26_v37 = vld [vmem:[%s4030_s2] sm:$0xff]  ;;  %v625_v38 = vpack.c.bf16 %v2671_v16, %v2666_v15  ;;  %v627_v41 = vpack.c.bf16 %v2701_v26, %v2696_v25  ;;  %v48_v50 = vld [vmem:[%s4030_s2 + $0xb0] sm:$0xff] }
  0x32   :  { %998 = vmatpush1.bf16.msra.mxu0 %v679_v23  ;;  %753 = vmatprep.subr.bf16.mxu1 %v618_v24  ;;  %v171_v23 = vsub.s32 4, %v154_v11  ;;  %v2691_v24 = vld [vmem:[%s4028_s0 + $0x238] sm:$0xff]  ;;  %v692_v51 = vpack.c.bf16 %v2717_v33, %v2712_v32  ;;  %v52_v61 = vld [vmem:[%s4030_s2 + $0xd0] sm:$0xff]  ;;  %v47_v3 = vld [vmem:[%s4030_s2 + $0xa8] sm:$0xff] }
  0x33   :  { %999 = vmatprep.subr.bf16.mxu0 %v682_v28  ;;  %v167_v28 = vsub.s32 3, %v154_v11  ;;  %v33_v44 = vld [vmem:[%s4030_s2 + $0x38] sm:$0xff]  ;;  %v40_v2 = vld [vmem:[%s4030_s2 + $0x70] sm:$0xff]  ;;  %v51_v9 = vld [vmem:[%s4030_s2 + $0xc8] sm:$0xff] }
  0x34   :  { %v41_v49 = vld [vmem:[%s4030_s2 + $0x78] sm:$0xff]  ;;  %v573_v11 = vld [vmem:[%s4028_s0 + $0x620] sm:$0xff]  ;;  %v575_v16 = vld [vmem:[%s4028_s0 + $0x630] sm:$0xff] }
  0x35   :  { %754 = vmatpush1.bf16.msra.mxu1 %v617_v34  ;;  %v62_v18 = vld [vmem:[%s4030_s2 + $0x120] sm:$0xff]  ;;  %v691_v32 = vpack.c.bf16 %v575_v16, %v573_v11  ;;  %v458_v25 = vld [vmem:[%s4028_s0 + $0x288] sm:$0xff]  ;;  %v69_v26 = vld [vmem:[%s4030_s2 + $0x158] sm:$0xff] }
  0x36   :  { %1000 = vmatpush1.bf16.msra.mxu0 %v681_v35  ;;  %755 = vmatprep.subr.bf16.mxu1 %v620_v36  ;;  %v31_v35 = vld [vmem:[%s4030_s2 + $0x28] sm:$0xff]  ;;  %v38_v36 = vld [vmem:[%s4030_s2 + $0x60] sm:$0xff] }
  0x37   :  { %1001 = vmatprep.subr.bf16.mxu0 %v684_v40  ;;  %v628_v40 = vpack.c.bf16 %v2691_v24, %v2686_v20  ;;  %v66_v24 = vld [vmem:[%s4030_s2 + $0x140] sm:$0xff] }
  0x38   :  { %v457_v11 = vld [vmem:[%s4028_s0 + $0x280] sm:$0xff] }
  0x39   :  { %756 = vmatpush1.bf16.msra.mxu1 %v619_v46  ;;  %v30_v46 = vld [vmem:[%s4030_s2 + $0x20] sm:$0xff] }
  0x3a   :  { %1002 = vmatpush1.bf16.msra.mxu0 %v683_v47  ;;  %757 = vmatprep.subr.bf16.mxu1 %v622_v48  ;;  %v37_v47 = vld [vmem:[%s4030_s2 + $0x58] sm:$0xff] }
  0x3b   :  { %1003 = vmatprep.subr.bf16.mxu0 %v686_v52  ;;  %v2161_v34 = vpop.eup %2160 }
  0x3c   :  { %v2736_v42 = vrot.slane %v2161_v34, %v159_v17  ;;  %v2738_v43 = vrot.slane %v2161_v34, %v175_v21  ;;  %v2743_v45 = vrot.slane %v2161_v34, %v155_v22  ;;  %v2751_v48 = vrot.slane %v2161_v34, %v171_v23  ;;  %v55_v17 = vld [vmem:[%s4030_s2 + $0xe8] sm:$0xff]  ;;  %v452_v22 = vld [vmem:[%s4028_s0 + $0x258] sm:$0xff] }
  0x3d   :  { %758 = vmatpush1.bf16.msra.mxu1 %v621_v59  ;;  %v2761_v52 = vrot.slane %v2161_v34, %v167_v28  ;;  %v2763_v53 = vrot.slane %v2161_v34, %v163_v29  ;;  %v2765_v54 = vrot.slane %v2161_v34, %v179_v30  ;;  %v45_v59 = vld [vmem:[%s4030_s2 + $0x98] sm:$0xff]  ;;  %v59_v23 = vld [vmem:[%s4030_s2 + $0x108] sm:$0xff] }
  0x3e   :  { %1004 = vmatpush1.bf16.msra.mxu0 %v685_v63  ;;  %759 = vmatprep.subr.bf16.mxu1 %v624_v0  ;;  %v189_v55 = vmul.f32 %v2736_v42, %v27_v27  ;;  %v196_v56 = vmul.f32 %v2736_v42, %v34_v31  ;;  %v193_v57 = vmul.f32 %v2738_v43, %v31_v35  ;;  %v578_v30 = vld [vmem:[%s4028_s0 + $0x648] sm:$0xff]  ;;  %v580_v31 = vld [vmem:[%s4028_s0 + $0x658] sm:$0xff] }
  0x3f   :  { %1005 = vmatprep.subr.bf16.mxu0 %v688_v4  ;;  %v200_v58 = vmul.f32 %v2738_v43, %v38_v36  ;;  %v188_v62 = vmul.f32 %v2743_v45, %v26_v37  ;;  %v195_v63 = vmul.f32 %v2743_v45, %v33_v44  ;;  %v192_v0 = vmul.f32 %v2751_v48, %v30_v46  ;;  %v44_v4 = vld [vmem:[%s4030_s2 + $0x90] sm:$0xff]  ;;  %v449_v36 = vld [vmem:[%s4028_s0 + $0x240] sm:$0xff] }
  0x40   :  { %v199_v1 = vmul.f32 %v2751_v48, %v37_v47  ;;  %v315_v5 = vpack.c.bf16 %v196_v56, %v189_v55  ;;  %v203_v7 = vmul.f32 %v2736_v42, %v41_v49  ;;  %v210_v8 = vmul.f32 %v2736_v42, %v48_v50  ;;  %v451_v37 = vld [vmem:[%s4028_s0 + $0x250] sm:$0xff]  ;;  %v453_v50 = vld [vmem:[%s4028_s0 + $0x260] sm:$0xff] }
  0x41   :  { %760 = vmatpush1.bf16.msra.mxu1 %v623_v10  ;;  %v319_v6 = vpack.c.bf16 %v200_v58, %v193_v57  ;;  %v450_v10 = vld [vmem:[%s4028_s0 + $0x248] sm:$0xff]  ;;  %v214_v15 = vmul.f32 %v2738_v43, %v52_v61  ;;  %v202_v20 = vmul.f32 %v2743_v45, %v40_v2  ;;  %v209_v21 = vmul.f32 %v2743_v45, %v47_v3  ;;  %v455_v55 = vld [vmem:[%s4028_s0 + $0x270] sm:$0xff]  ;;  %v577_v56 = vld [vmem:[%s4028_s0 + $0x640] sm:$0xff] }
  0x42   :  { %1006 = vmatpush1.bf16.msra.mxu0 %v687_v12  ;;  %852 = vmatprep.subr.bf16.mxu1 %v626_v13  ;;  %v314_v12 = vpack.c.bf16 %v195_v63, %v188_v62  ;;  %v318_v13 = vpack.c.bf16 %v199_v1, %v192_v0  ;;  %v322_v19 = vpack.c.bf16 %v210_v8, %v203_v7  ;;  %v579_v57 = vld [vmem:[%s4028_s0 + $0x650] sm:$0xff]  ;;  %v61_v61 = vld [vmem:[%s4030_s2 + $0x118] sm:$0xff]  ;;  %v58_v62 = vld [vmem:[%s4030_s2 + $0x100] sm:$0xff] }
  0x43   :  { %1098 = vmatprep.subr.bf16.mxu0 %v690_v14  ;;  %v207_v14 = vmul.f32 %v2738_v43, %v45_v59  ;;  %761 = vmatprep.mubr.bf16.mxu1 %v315_v5  ;;  %v206_v28 = vmul.f32 %v2751_v48, %v44_v4  ;;  %v213_v29 = vmul.f32 %v2751_v48, %v51_v9  ;;  %v65_v63 = vld [vmem:[%s4030_s2 + $0x138] sm:$0xff]  ;;  %v80_v5 = vld [vmem:[%s4030_s2 + $0x1b0] sm:$0xff] }
  0x44   :  { %1007 = vmatprep.mubr.bf16.mxu0 %v319_v6  ;;  %762 = vmatmul.mubr.bf16.vlgmr.msra.gmra.mrb[0].mxu1 %v314_v12  ;;  %v217_v33 = vmul.f32 %v2736_v42, %v55_v17  ;;  %v224_v34 = vmul.f32 %v2736_v42, %v62_v18  ;;  %v630_v35 = vpack.c.bf16 %v452_v22, %v450_v10  ;;  %v460_v3 = vld [vmem:[%s4028_s0 + $0x298] sm:$0xff]  ;;  %v459_v17 = vld [vmem:[%s4028_s0 + $0x290] sm:$0xff]  ;;  %v462_v22 = vld [vmem:[%s4028_s0 + $0x2a8] sm:$0xff] }
  0x45   :  { %1008 = vmatmul.mubr.bf16.vlgmr.msra.gmra.mrb[0].mxu0 %v318_v13  ;;  %v326_v27 = vpack.c.bf16 %v214_v15, %v207_v14  ;;  %853 = vmatpush1.bf16.msra.mxu1 %v625_v38  ;;  %v221_v44 = vmul.f32 %v2738_v43, %v59_v23  ;;  %v228_v38 = vmul.f32 %v2738_v43, %v66_v24  ;;  %v73_v4 = vld [vmem:[%s4030_s2 + $0x178] sm:$0xff]  ;;  %v582_v14 = vld [vmem:[%s4028_s0 + $0x668] sm:$0xff] }
  0x46   :  { %1099 = vmatpush1.bf16.msra.mxu0 %v689_v39  ;;  %854 = vmatprep.subr.bf16.mxu1 %v628_v40  ;;  %v454_v39 = vld [vmem:[%s4028_s0 + $0x268] sm:$0xff]  ;;  %v456_v40 = vld [vmem:[%s4028_s0 + $0x278] sm:$0xff]  ;;  %v694_v46 = vpack.c.bf16 %v580_v31, %v578_v30  ;;  %v321_v47 = vpack.c.bf16 %v209_v21, %v202_v20  ;;  %v325_v49 = vpack.c.bf16 %v213_v29, %v206_v28  ;;  %v581_v20 = vld [vmem:[%s4028_s0 + $0x660] sm:$0xff] }
  0x47   :  { %771 = vmatprep.mubr.bf16.mxu1 %v322_v19  ;;  %1017 = vmatprep.mubr.bf16.mxu0 %v326_v27  ;;  %v629_v58 = vpack.c.bf16 %v451_v37, %v449_v36  ;;  %v329_v59 = vpack.c.bf16 %v224_v34, %v217_v33  ;;  %v632_v0 = vpack.c.bf16 %v456_v40, %v454_v39  ;;  %v584_v15 = vld [vmem:[%s4028_s0 + $0x678] sm:$0xff]  ;;  %v583_v21 = vld [vmem:[%s4028_s0 + $0x670] sm:$0xff]  ;;  %v75_v29 = vld [vmem:[%s4030_s2 + $0x188] sm:$0xff] }
  0x48   :  { %1100 = vmatprep.subr.bf16.mxu0 %v692_v51  ;;  %v54_v51 = vld [vmem:[%s4030_s2 + $0xe0] sm:$0xff]  ;;  %v333_v1 = vpack.c.bf16 %v228_v38, %v221_v44  ;;  %v693_v6 = vpack.c.bf16 %v579_v57, %v577_v56  ;;  %v223_v7 = vmul.f32 %v2743_v45, %v61_v61  ;;  %v220_v8 = vmul.f32 %v2751_v48, %v58_v62  ;;  %v464_v23 = vld [vmem:[%s4028_s0 + $0x2b8] sm:$0xff]  ;;  %v68_v28 = vld [vmem:[%s4030_s2 + $0x150] sm:$0xff] }
  0x49   :  { %855 = vmatpush1.bf16.msra.mxu1 %v627_v41  ;;  %v76_v41 = vld [vmem:[%s4030_s2 + $0x190] sm:$0xff]  ;;  %v216_v2 = vmul.f32 %v2743_v45, %v54_v51  ;;  %v227_v9 = vmul.f32 %v2751_v48, %v65_v63  ;;  %v631_v10 = vpack.c.bf16 %v455_v55, %v453_v50  ;;  %v231_v12 = vmul.f32 %v2736_v42, %v69_v26  ;;  %v461_v30 = vld [vmem:[%s4028_s0 + $0x2a0] sm:$0xff]  ;;  %v79_v36 = vld [vmem:[%s4030_s2 + $0x1a8] sm:$0xff] }
  0x4a   :  { %1101 = vmatpush1.bf16.msra.mxu0 %v691_v32  ;;  %856 = vmatprep.subr.bf16.mxu1 %v630_v35  ;;  %v238_v13 = vmul.f32 %v2736_v42, %v76_v41  ;;  %v634_v16 = vpack.c.bf16 %v460_v3, %v458_v25  ;;  %v235_v18 = vmul.f32 %v2738_v43, %v73_v4  ;;  %v463_v34 = vld [vmem:[%s4028_s0 + $0x2b0] sm:$0xff]  ;;  %v466_v39 = vld [vmem:[%s4028_s0 + $0x2c8] sm:$0xff]  ;;  %v94_v55 = vld [vmem:[%s4030_s2 + $0x220] sm:$0xff] }
  0x4b   :  { %1102 = vmatprep.subr.bf16.mxu0 %v694_v46  ;;  %v242_v19 = vmul.f32 %v2738_v43, %v80_v5  ;;  %v328_v24 = vpack.c.bf16 %v223_v7, %v216_v2  ;;  %v332_v27 = vpack.c.bf16 %v227_v9, %v220_v8  ;;  %v696_v31 = vpack.c.bf16 %v584_v15, %v582_v14  ;;  %v72_v35 = vld [vmem:[%s4030_s2 + $0x170] sm:$0xff]  ;;  %v83_v40 = vld [vmem:[%s4030_s2 + $0x1c8] sm:$0xff]  ;;  %v90_v46 = vld [vmem:[%s4030_s2 + $0x200] sm:$0xff] }
  0x4c   :  { %772 = vmatmul.mubr.bf16.gmra.mrb[4].mxu1 %v321_v47  ;;  %v633_v32 = vpack.c.bf16 %v459_v17, %v457_v11  ;;  %v336_v33 = vpack.c.bf16 %v238_v13, %v231_v12  ;;  %v695_v37 = vpack.c.bf16 %v583_v21, %v581_v20  ;;  %v636_v44 = vpack.c.bf16 %v464_v23, %v462_v22  ;;  %v87_v50 = vld [vmem:[%s4030_s2 + $0x1e8] sm:$0xff]  ;;  %v467_v25 = vld [vmem:[%s4028_s0 + $0x2d0] sm:$0xff]  ;;  %v585_v2 = vld [vmem:[%s4028_s0 + $0x680] sm:$0xff] }
  0x4d   :  { %1018 = vmatmul.mubr.bf16.gmra.mrb[4].mxu0 %v325_v49  ;;  %857 = vmatpush1.bf16.msra.mxu1 %v629_v58  ;;  %v340_v38 = vpack.c.bf16 %v242_v19, %v235_v18  ;;  %v230_v47 = vmul.f32 %v2743_v45, %v68_v28  ;;  %v468_v49 = vld [vmem:[%s4028_s0 + $0x2d8] sm:$0xff]  ;;  %v237_v51 = vmul.f32 %v2743_v45, %v75_v29  ;;  %v586_v63 = vld [vmem:[%s4028_s0 + $0x688] sm:$0xff]  ;;  %v587_v3 = vld [vmem:[%s4028_s0 + $0x690] sm:$0xff] }
  0x4e   :  { %781 = vmatprep.mubr.bf16.mxu1 %v329_v59  ;;  %858 = vmatprep.subr.bf16.mxu1 %v632_v0  ;;  %v234_v56 = vmul.f32 %v2751_v48, %v72_v35  ;;  %v241_v57 = vmul.f32 %v2751_v48, %v79_v36  ;;  %v635_v58 = vpack.c.bf16 %v463_v34, %v461_v30  ;;  %v465_v59 = vld [vmem:[%s4028_s0 + $0x2c0] sm:$0xff]  ;;  %v588_v0 = vld [vmem:[%s4028_s0 + $0x698] sm:$0xff]  ;;  %v470_v5 = vld [vmem:[%s4028_s0 + $0x2e8] sm:$0xff] }
  0x4f   :  { %1027 = vmatprep.mubr.bf16.mxu0 %v333_v1  ;;  %1103 = vmatpush1.bf16.msra.mxu0 %v693_v6  ;;  %v245_v61 = vmul.f32 %v2736_v42, %v83_v40  ;;  %v252_v62 = vmul.f32 %v2736_v42, %v90_v46  ;;  %v638_v1 = vpack.c.bf16 %v468_v49, %v466_v39  ;;  %v82_v4 = vld [vmem:[%s4030_s2 + $0x1c0] sm:$0xff]  ;;  %v472_v6 = vld [vmem:[%s4028_s0 + $0x2f8] sm:$0xff]  ;;  %v474_v17 = vld [vmem:[%s4028_s0 + $0x308] sm:$0xff] }
  0x50   :  { %1104 = vmatprep.subr.bf16.mxu0 %v696_v31  ;;  %v249_v26 = vmul.f32 %v2738_v43, %v87_v50  ;;  %v256_v41 = vmul.f32 %v2738_v43, %v94_v55  ;;  %v335_v7 = vpack.c.bf16 %v237_v51, %v230_v47  ;;  %v339_v8 = vpack.c.bf16 %v241_v57, %v234_v56  ;;  %v89_v9 = vld [vmem:[%s4030_s2 + $0x1f8] sm:$0xff]  ;;  %v469_v15 = vld [vmem:[%s4028_s0 + $0x2e0] sm:$0xff]  ;;  %v104_v23 = vld [vmem:[%s4030_s2 + $0x270] sm:$0xff] }
  0x51   :  { %859 = vmatpush1.bf16.msra.mxu1 %v631_v10  ;;  %v86_v10 = vld [vmem:[%s4030_s2 + $0x1e0] sm:$0xff]  ;;  %v93_v11 = vld [vmem:[%s4030_s2 + $0x218] sm:$0xff]  ;;  %v698_v12 = vpack.c.bf16 %v588_v0, %v586_v63  ;;  %v637_v13 = vpack.c.bf16 %v467_v25, %v465_v59  ;;  %v343_v14 = vpack.c.bf16 %v252_v62, %v245_v61  ;;  %v697_v18 = vpack.c.bf16 %v587_v3, %v585_v2  ;;  %v108_v28 = vld [vmem:[%s4030_s2 + $0x290] sm:$0xff] }
  0x52   :  { %860 = vmatprep.subr.bf16.mxu1 %v634_v16  ;;  %v471_v16 = vld [vmem:[%s4028_s0 + $0x2f0] sm:$0xff]  ;;  %v347_v19 = vpack.c.bf16 %v256_v41, %v249_v26  ;;  %v640_v20 = vpack.c.bf16 %v472_v6, %v470_v5  ;;  %v476_v21 = vld [vmem:[%s4028_s0 + $0x318] sm:$0xff]  ;;  %v590_v29 = vld [vmem:[%s4028_s0 + $0x6a8] sm:$0xff]  ;;  %v251_v30 = vmul.f32 %v2743_v45, %v89_v9  ;;  %v248_v31 = vmul.f32 %v2751_v48, %v86_v10 }
  0x53   :  { %1105 = vmatpush1.bf16.msra.mxu0 %v695_v37  ;;  %v97_v22 = vld [vmem:[%s4030_s2 + $0x238] sm:$0xff]  ;;  %v589_v34 = vld [vmem:[%s4028_s0 + $0x6a0] sm:$0xff]  ;;  %v591_v35 = vld [vmem:[%s4028_s0 + $0x6b0] sm:$0xff]  ;;  %v639_v36 = vpack.c.bf16 %v471_v16, %v469_v15  ;;  %v270_v47 = vmul.f32 %v2738_v43, %v108_v28 }
  0x54   :  { %782 = vmatmul.mubr.bf16.gmra.mrb[8].mxu1 %v328_v24  ;;  %1106 = vmatprep.subr.bf16.mxu0 %v698_v12  ;;  %v244_v24 = vmul.f32 %v2743_v45, %v82_v4  ;;  %v259_v37 = vmul.f32 %v2736_v42, %v97_v22  ;;  %v473_v39 = vld [vmem:[%s4028_s0 + $0x300] sm:$0xff]  ;;  %v475_v40 = vld [vmem:[%s4028_s0 + $0x310] sm:$0xff]  ;;  %v478_v49 = vld [vmem:[%s4028_s0 + $0x328] sm:$0xff]  ;;  %v699_v51 = vpack.c.bf16 %v591_v35, %v589_v34 }
  0x55   :  { %1028 = vmatmul.mubr.bf16.gmra.mrb[8].mxu0 %v332_v27  ;;  %861 = vmatpush1.bf16.msra.mxu1 %v633_v32  ;;  %v101_v27 = vld [vmem:[%s4030_s2 + $0x258] sm:$0xff]  ;;  %v255_v32 = vmul.f32 %v2751_v48, %v93_v11  ;;  %v103_v59 = vld [vmem:[%s4030_s2 + $0x268] sm:$0xff]  ;;  %v100_v61 = vld [vmem:[%s4030_s2 + $0x250] sm:$0xff]  ;;  %v641_v62 = vpack.c.bf16 %v475_v40, %v473_v39 }
  0x56   :  { %791 = vmatprep.mubr.bf16.mxu1 %v336_v33  ;;  %862 = vmatprep.subr.bf16.mxu1 %v636_v44  ;;  %v592_v33 = vld [vmem:[%s4028_s0 + $0x6b8] sm:$0xff]  ;;  %v266_v44 = vmul.f32 %v2736_v42, %v104_v23  ;;  %v263_v46 = vmul.f32 %v2738_v43, %v101_v27  ;;  %v342_v56 = vpack.c.bf16 %v251_v30, %v244_v24  ;;  %v107_v0 = vld [vmem:[%s4030_s2 + $0x288] sm:$0xff]  ;;  %v479_v25 = vld [vmem:[%s4028_s0 + $0x330] sm:$0xff] }
  0x57   :  { %1037 = vmatprep.mubr.bf16.mxu0 %v340_v38  ;;  %1107 = vmatpush1.bf16.msra.mxu0 %v697_v18  ;;  %v642_v38 = vpack.c.bf16 %v476_v21, %v474_v17  ;;  %v480_v50 = vld [vmem:[%s4028_s0 + $0x338] sm:$0xff]  ;;  %v700_v55 = vpack.c.bf16 %v592_v33, %v590_v29  ;;  %v346_v57 = vpack.c.bf16 %v255_v32, %v248_v31  ;;  %v482_v2 = vld [vmem:[%s4028_s0 + $0x348] sm:$0xff]  ;;  %v118_v4 = vld [vmem:[%s4030_s2 + $0x2e0] sm:$0xff] }
  0x58   :  { %v350_v63 = vpack.c.bf16 %v266_v44, %v259_v37  ;;  %v354_v26 = vpack.c.bf16 %v270_v47, %v263_v46  ;;  %v644_v41 = vpack.c.bf16 %v480_v50, %v478_v49  ;;  %v111_v3 = vld [vmem:[%s4030_s2 + $0x2a8] sm:$0xff]  ;;  %v484_v6 = vld [vmem:[%s4028_s0 + $0x358] sm:$0xff]  ;;  %v265_v9 = vmul.f32 %v2743_v45, %v103_v59  ;;  %v481_v16 = vld [vmem:[%s4028_s0 + $0x340] sm:$0xff] }
  0x59   :  { %863 = vmatpush1.bf16.msra.mxu1 %v635_v58  ;;  %v96_v58 = vld [vmem:[%s4030_s2 + $0x230] sm:$0xff]  ;;  %1108 = vmatprep.subr.bf16.mxu0 %v700_v55  ;;  %v262_v10 = vmul.f32 %v2751_v48, %v100_v61  ;;  %v269_v11 = vmul.f32 %v2751_v48, %v107_v0  ;;  %v646_v15 = vpack.c.bf16 %v484_v6, %v482_v2  ;;  %v486_v21 = vld [vmem:[%s4028_s0 + $0x368] sm:$0xff]  ;;  %v488_v22 = vld [vmem:[%s4028_s0 + $0x378] sm:$0xff] }
  0x5a   :  { %864 = vmatprep.subr.bf16.mxu1 %v638_v1  ;;  %v477_v1 = vld [vmem:[%s4028_s0 + $0x320] sm:$0xff]  ;;  %v258_v5 = vmul.f32 %v2743_v45, %v96_v58  ;;  %v483_v17 = vld [vmem:[%s4028_s0 + $0x350] sm:$0xff]  ;;  %v117_v27 = vld [vmem:[%s4030_s2 + $0x2d8] sm:$0xff] }
  0x5b   :  { %1109 = vmatpush1.bf16.msra.mxu0 %v699_v51  ;;  %v643_v12 = vpack.c.bf16 %v479_v25, %v477_v1  ;;  %v353_v24 = vpack.c.bf16 %v269_v11, %v262_v10  ;;  %v114_v28 = vld [vmem:[%s4030_s2 + $0x2c0] sm:$0xff]  ;;  %v121_v29 = vld [vmem:[%s4030_s2 + $0x2f8] sm:$0xff]  ;;  %v645_v30 = vpack.c.bf16 %v483_v17, %v481_v16  ;;  %v487_v33 = vld [vmem:[%s4028_s0 + $0x370] sm:$0xff] }
  0x5c   :  { %792 = vmatmul.mubr.bf16.gmra.mrb[12].mxu1 %v335_v7  ;;  %v115_v7 = vld [vmem:[%s4030_s2 + $0x2c8] sm:$0xff]  ;;  %v349_v23 = vpack.c.bf16 %v265_v9, %v258_v5  ;;  %v485_v32 = vld [vmem:[%s4028_s0 + $0x360] sm:$0xff]  ;;  %v125_v37 = vld [vmem:[%s4030_s2 + $0x318] sm:$0xff] }
  0x5d   :  { %1038 = vmatmul.mubr.bf16.gmra.mrb[12].mxu0 %v339_v8  ;;  %865 = vmatpush1.bf16.msra.mxu1 %v637_v13  ;;  %v122_v8 = vld [vmem:[%s4030_s2 + $0x300] sm:$0xff]  ;;  %v273_v13 = vmul.f32 %v2736_v42, %v111_v3  ;;  %v277_v18 = vmul.f32 %v2738_v43, %v115_v7  ;;  %v490_v34 = vld [vmem:[%s4028_s0 + $0x388] sm:$0xff]  ;;  %v132_v44 = vld [vmem:[%s4030_s2 + $0x350] sm:$0xff] }
  0x5e   :  { %801 = vmatprep.mubr.bf16.mxu1 %v343_v14  ;;  %1047 = vmatprep.mubr.bf16.mxu0 %v347_v19  ;;  %v280_v14 = vmul.f32 %v2736_v42, %v118_v4  ;;  %v284_v19 = vmul.f32 %v2738_v43, %v122_v8 }
  0x5f   :  { %866 = vmatprep.subr.bf16.mxu1 %v640_v20  ;;  %v110_v20 = vld [vmem:[%s4030_s2 + $0x2a0] sm:$0xff] }
  0x60   :  { %v357_v31 = vpack.c.bf16 %v280_v14, %v273_v13  ;;  %v361_v35 = vpack.c.bf16 %v284_v19, %v277_v18 }
  0x61   :  { %867 = vmatpush1.bf16.msra.mxu1 %v639_v36  ;;  %v648_v36 = vpack.c.bf16 %v488_v22, %v486_v21 }
  0x62   :  { %868 = vmatprep.subr.bf16.mxu1 %v642_v38 }
  0x64   :  { %802 = vmatmul.mubr.bf16.gmra.mrb[16].mxu1 %v342_v56 }
  0x65   :  { %1048 = vmatmul.mubr.bf16.gmra.mrb[16].mxu0 %v346_v57  ;;  %869 = vmatpush1.bf16.msra.mxu1 %v641_v62 }
  0x66   :  { %811 = vmatprep.mubr.bf16.mxu1 %v350_v63  ;;  %1057 = vmatprep.mubr.bf16.mxu0 %v354_v26 }
  0x67   :  { %870 = vmatprep.subr.bf16.mxu1 %v644_v41 }
  0x69   :  { %871 = vmatpush1.bf16.msra.mxu1 %v643_v12 }
  0x6a   :  { %872 = vmatprep.subr.bf16.mxu1 %v646_v15 }
  0x6b   :  { %9 = vsyncpa [#allocation3], 0  ;;  %v272_v38 = vmul.f32 %v2743_v45, %v110_v20  ;;  %v492_v39 = vld [vmem:[%s4028_s0 + $0x398] sm:$0xff]  ;;  %v136_v46 = vld [vmem:[%s4030_s2 + $0x370] sm:$0xff]  ;;  %v279_v47 = vmul.f32 %v2743_v45, %v117_v27  ;;  %v276_v49 = vmul.f32 %v2751_v48, %v114_v28  ;;  %v283_v50 = vmul.f32 %v2751_v48, %v121_v29  ;;  %s2232_s8 = smov 1  }
  0x6c   :  { %v129_v40 = vld [vmem:[%s4030_s2 + $0x338] sm:$0xff]  ;;  %812 = vmatmul.mubr.bf16.gmra.mrb[20].mxu1 %v349_v23  ;;  %v647_v55 = vpack.c.bf16 %v487_v33, %v485_v32  ;;  %v287_v51 = vmul.f32 %v2736_v42, %v125_v37  ;;  %v294_v56 = vmul.f32 %v2736_v42, %v132_v44  ;;  %v650_v57 = vpack.c.bf16 %v492_v39, %v490_v34  ;;  %v489_v58 = vld [vmem:[%s4028_s0 + $0x380] sm:$0xff]  ;;  %v491_v59 = vld [vmem:[%s4028_s0 + $0x390] sm:$0xff] }
  0x6d   :  { %1058 = vmatmul.mubr.bf16.gmra.mrb[20].mxu0 %v353_v24  ;;  %873 = vmatpush1.bf16.msra.mxu1 %v645_v30  ;;  %v291_v61 = vmul.f32 %v2738_v43, %v129_v40  ;;  %v298_v62 = vmul.f32 %v2738_v43, %v136_v46  ;;  %v124_v63 = vld [vmem:[%s4030_s2 + $0x310] sm:$0xff]  ;;  %v494_v0 = vld [vmem:[%s4028_s0 + $0x3a8] sm:$0xff]  ;;  %v496_v1 = vld [vmem:[%s4028_s0 + $0x3b8] sm:$0xff]  ;;  %v356_v25 = vpack.c.bf16 %v279_v47, %v272_v38  ;;  %vm701_vm0 = vcmask 785408  }
  0x6e   :  { %821 = vmatprep.mubr.bf16.mxu1 %v357_v31  ;;  %1067 = vmatprep.mubr.bf16.mxu0 %v361_v35  ;;  %v360_v26 = vpack.c.bf16 %v283_v50, %v276_v49  ;;  %v131_v41 = vld [vmem:[%s4030_s2 + $0x348] sm:$0xff]  ;;  %v128_v2 = vld [vmem:[%s4030_s2 + $0x330] sm:$0xff]  ;;  %v364_v4 = vpack.c.bf16 %v294_v56, %v287_v51  ;;  %v649_v5 = vpack.c.bf16 %v491_v59, %v489_v58  ;;  %v493_v6 = vld [vmem:[%s4028_s0 + $0x3a0] sm:$0xff]  ;;  %vm1222_vm1 = vcmask 556032  }
  0x6f   :  { %874 = vmatprep.subr.bf16.mxu1 %v648_v36  ;;  %v135_v3 = vld [vmem:[%s4030_s2 + $0x368] sm:$0xff]  ;;  %v495_v7 = vld [vmem:[%s4028_s0 + $0x3b0] sm:$0xff]  ;;  %v368_v9 = vpack.c.bf16 %v298_v62, %v291_v61  ;;  %v652_v10 = vpack.c.bf16 %v496_v1, %v494_v0  ;;  %v146_v11 = vld [vmem:[%s4030_s2 + $0x3c0] sm:$0xff]  ;;  %v286_v14 = vmul.f32 %v2743_v45, %v124_v63  ;;  %v293_v15 = vmul.f32 %v2743_v45, %v131_v41 }
  0x70   :  { %v139_v8 = vld [vmem:[%s4030_s2 + $0x388] sm:$0xff]  ;;  %v150_v13 = vld [vmem:[%s4030_s2 + $0x3e0] sm:$0xff]  ;;  %v290_v16 = vmul.f32 %v2751_v48, %v128_v2  ;;  %v500_v18 = vld [vmem:[%s4028_s0 + $0x3d8] sm:$0xff]  ;;  %v297_v19 = vmul.f32 %v2751_v48, %v135_v3  ;;  %v651_v20 = vpack.c.bf16 %v495_v7, %v493_v6  ;;  %v308_v22 = vmul.f32 %v2736_v42, %v146_v11 }
  0x71   :  { %875 = vmatpush1.bf16.msra.mxu1 %v647_v55  ;;  %v143_v12 = vld [vmem:[%s4030_s2 + $0x3a8] sm:$0xff]  ;;  %v301_v21 = vmul.f32 %v2736_v42, %v139_v8  ;;  %v312_v24 = vmul.f32 %v2738_v43, %v150_v13  ;;  %v497_v28 = vld [vmem:[%s4028_s0 + $0x3c0] sm:$0xff]  ;;  %v499_v29 = vld [vmem:[%s4028_s0 + $0x3d0] sm:$0xff]  ;;  %v363_v30 = vpack.c.bf16 %v293_v15, %v286_v14 }
  0x72   :  { %876 = vmatprep.subr.bf16.mxu1 %v650_v57  ;;  %v498_v17 = vld [vmem:[%s4028_s0 + $0x3c8] sm:$0xff]  ;;  %v305_v23 = vmul.f32 %v2738_v43, %v143_v12  ;;  %v367_v31 = vpack.c.bf16 %v297_v19, %v290_v16  ;;  %v138_v42 = vld [vmem:[%s4030_s2 + $0x380] sm:$0xff]  ;;  %v504_v32 = vld [vmem:[%s4028_s0 + $0x3f8] sm:$0xff]  ;;  %v653_v44 = vpack.c.bf16 %v499_v29, %v497_v28 }
  0x73   :  { %v654_v27 = vpack.c.bf16 %v500_v18, %v498_v17  ;;  %v502_v43 = vld [vmem:[%s4028_s0 + $0x3e8] sm:$0xff]  ;;  %v371_v33 = vpack.c.bf16 %v308_v22, %v301_v21  ;;  %v145_v35 = vld [vmem:[%s4030_s2 + $0x3b8] sm:$0xff]  ;;  %v142_v36 = vld [vmem:[%s4030_s2 + $0x3a0] sm:$0xff]  ;;  %v300_v40 = vmul.f32 %v2743_v45, %v138_v42 }
  0x74   :  { %822 = vmatmul.mubr.bf16.gmra.mrb[24].mxu1 %v356_v25  ;;  %v375_v34 = vpack.c.bf16 %v312_v24, %v305_v23  ;;  %v149_v37 = vld [vmem:[%s4030_s2 + $0x3d8] sm:$0xff]  ;;  %v36_v39 = vld [vmem:[%s4030_s2 + $0x50] sm:$0xff]  ;;  %v656_v46 = vpack.c.bf16 %v504_v32, %v502_v43  ;;  %v501_v47 = vld [vmem:[%s4028_s0 + $0x3e0] sm:$0xff]  ;;  %v307_v50 = vmul.f32 %v2743_v45, %v145_v35  ;;  %v304_v55 = vmul.f32 %v2751_v48, %v142_v36 }
  0x75   :  { %1068 = vmatmul.mubr.bf16.gmra.mrb[24].mxu0 %v360_v26  ;;  %831 = vmatprep.mubr.bf16.mxu1 %v364_v4  ;;  %v29_v38 = vld [vmem:[%s4030_s2 + $0x18] sm:$0xff]  ;;  %v503_v49 = vld [vmem:[%s4028_s0 + $0x3f0] sm:$0xff]  ;;  %v311_v51 = vmul.f32 %v2751_v48, %v149_v37  ;;  %v198_v57 = vmul.f32 %v2761_v52, %v36_v39  ;;  %v35_v48 = vld [vmem:[%s4030_s2 + $0x48] sm:$0xff] }
  0x76   :  { %877 = vmatpush1.bf16.msra.mxu1 %v649_v5  ;;  %1077 = vmatprep.mubr.bf16.mxu0 %v368_v9  ;;  %v191_v56 = vmul.f32 %v2761_v52, %v29_v38  ;;  %v655_v58 = vpack.c.bf16 %v503_v49, %v501_v47  ;;  %v370_v59 = vpack.c.bf16 %v307_v50, %v300_v40  ;;  %v28_v62 = vld [vmem:[%s4030_s2 + $0x10] sm:$0xff]  ;;  %v39_v0 = vld [vmem:[%s4030_s2 + $0x68] sm:$0xff]  ;;  %v50_v25 = vld [vmem:[%s4030_s2 + $0xc0] sm:$0xff] }
  0x77   :  { %878 = vmatprep.subr.bf16.mxu1 %v652_v10  ;;  %v374_v61 = vpack.c.bf16 %v311_v51, %v304_v55  ;;  %v32_v63 = vld [vmem:[%s4030_s2 + $0x30] sm:$0xff]  ;;  %v43_v1 = vld [vmem:[%s4030_s2 + $0x88] sm:$0xff]  ;;  %v190_v26 = vmul.f32 %v2763_v53, %v28_v62  ;;  %v197_v41 = vmul.f32 %v2763_v53, %v35_v48  ;;  %v201_v3 = vmul.f32 %v2765_v54, %v39_v0  ;;  %v42_v8 = vld [vmem:[%s4030_s2 + $0x80] sm:$0xff] }
  0x78   :  { %v317_v45 = vpack.c.bf16 %v198_v57, %v191_v56  ;;  %v194_v2 = vmul.f32 %v2765_v54, %v32_v63  ;;  %v205_v4 = vmul.f32 %v2761_v52, %v43_v1  ;;  %v212_v5 = vmul.f32 %v2761_v52, %v50_v25  ;;  %v49_v10 = vld [vmem:[%s4030_s2 + $0xb8] sm:$0xff]  ;;  %v46_v11 = vld [vmem:[%s4030_s2 + $0xa0] sm:$0xff]  ;;  %v64_v14 = vld [vmem:[%s4030_s2 + $0x130] sm:$0xff] }
  0x79   :  { %v316_v6 = vpack.c.bf16 %v197_v41, %v190_v26  ;;  %v53_v12 = vld [vmem:[%s4030_s2 + $0xd8] sm:$0xff]  ;;  %v204_v15 = vmul.f32 %v2763_v53, %v42_v8  ;;  %v211_v16 = vmul.f32 %v2763_v53, %v49_v10  ;;  %v208_v17 = vmul.f32 %v2765_v54, %v46_v11  ;;  %v56_v23 = vld [vmem:[%s4030_s2 + $0xf0] sm:$0xff]  ;;  %v67_v29 = vld [vmem:[%s4030_s2 + $0x148] sm:$0xff] }
  0x7a   :  { %879 = vmatpush1.bf16.msra.mxu1 %v651_v20  ;;  %v320_v7 = vpack.c.bf16 %v201_v3, %v194_v2  ;;  %v324_v9 = vpack.c.bf16 %v212_v5, %v205_v4  ;;  %v57_v13 = vld [vmem:[%s4030_s2 + $0xf8] sm:$0xff]  ;;  %v215_v18 = vmul.f32 %v2765_v54, %v53_v12  ;;  %v226_v20 = vmul.f32 %v2761_v52, %v64_v14  ;;  %v60_v28 = vld [vmem:[%s4030_s2 + $0x110] sm:$0xff]  ;;  %v74_v40 = vld [vmem:[%s4030_s2 + $0x180] sm:$0xff] }
  0x7b   :  { %880 = vmatprep.subr.bf16.mxu1 %v654_v27  ;;  %v219_v19 = vmul.f32 %v2761_v52, %v57_v13  ;;  %v323_v21 = vpack.c.bf16 %v211_v16, %v204_v15  ;;  %v63_v27 = vld [vmem:[%s4030_s2 + $0x128] sm:$0xff]  ;;  %v218_v42 = vmul.f32 %v2763_v53, %v56_v23  ;;  %v222_v32 = vmul.f32 %v2765_v54, %v60_v28  ;;  %v77_v39 = vld [vmem:[%s4030_s2 + $0x198] sm:$0xff]  ;;  %v92_v49 = vld [vmem:[%s4030_s2 + $0x210] sm:$0xff] }
  0x7c   :  { %832 = vmatmul.mubr.bf16.gmra.mrb[28].mxu1 %v363_v30  ;;  %v327_v22 = vpack.c.bf16 %v215_v18, %v208_v17  ;;  %v71_v30 = vld [vmem:[%s4030_s2 + $0x168] sm:$0xff]  ;;  %v225_v43 = vmul.f32 %v2763_v53, %v63_v27  ;;  %v85_v47 = vld [vmem:[%s4030_s2 + $0x1d8] sm:$0xff]  ;;  %v239_v55 = vmul.f32 %v2763_v53, %v77_v39  ;;  %v236_v51 = vmul.f32 %v2765_v54, %v74_v40  ;;  %v84_v62 = vld [vmem:[%s4030_s2 + $0x1d0] sm:$0xff] }
  0x7d   :  { %1078 = vmatmul.mubr.bf16.gmra.mrb[28].mxu0 %v367_v31  ;;  %841 = vmatprep.mubr.bf16.mxu1 %v371_v33  ;;  %v331_v24 = vpack.c.bf16 %v226_v20, %v219_v19  ;;  %v78_v31 = vld [vmem:[%s4030_s2 + $0x1a0] sm:$0xff]  ;;  %v229_v33 = vmul.f32 %v2765_v54, %v67_v29  ;;  %v247_v57 = vmul.f32 %v2761_v52, %v85_v47  ;;  %v91_v48 = vld [vmem:[%s4030_s2 + $0x208] sm:$0xff]  ;;  %v88_v63 = vld [vmem:[%s4030_s2 + $0x1f0] sm:$0xff] }
  0x7e   :  { %1087 = vmatprep.mubr.bf16.mxu0 %v375_v34  ;;  %881 = vmatpush1.bf16.msra.mxu1 %v653_v44  ;;  %v233_v34 = vmul.f32 %v2761_v52, %v71_v30  ;;  %v240_v35 = vmul.f32 %v2761_v52, %v78_v31  ;;  %v330_v36 = vpack.c.bf16 %v225_v43, %v218_v42  ;;  %v70_v44 = vld [vmem:[%s4030_s2 + $0x160] sm:$0xff]  ;;  %v95_v0 = vld [vmem:[%s4030_s2 + $0x228] sm:$0xff]  ;;  %v105_v10 = vld [vmem:[%s4030_s2 + $0x278] sm:$0xff] }
  0x7f   :  { %882 = vmatprep.subr.bf16.mxu1 %v656_v46  ;;  %v334_v37 = vpack.c.bf16 %v229_v33, %v222_v32  ;;  %v81_v46 = vld [vmem:[%s4030_s2 + $0x1b8] sm:$0xff]  ;;  %v232_v50 = vmul.f32 %v2763_v53, %v70_v44  ;;  %v99_v1 = vld [vmem:[%s4030_s2 + $0x248] sm:$0xff]  ;;  %v106_v25 = vld [vmem:[%s4030_s2 + $0x280] sm:$0xff]  ;;  %v246_v26 = vmul.f32 %v2763_v53, %v84_v62  ;;  %v253_v41 = vmul.f32 %v2763_v53, %v91_v48 }
  0x80   :  { %v338_v38 = vpack.c.bf16 %v240_v35, %v233_v34  ;;  %v243_v56 = vmul.f32 %v2765_v54, %v81_v46  ;;  %v250_v2 = vmul.f32 %v2765_v54, %v88_v63  ;;  %v257_v3 = vmul.f32 %v2765_v54, %v95_v0  ;;  %v98_v8 = vld [vmem:[%s4030_s2 + $0x240] sm:$0xff]  ;;  %v109_v12 = vld [vmem:[%s4030_s2 + $0x298] sm:$0xff]  ;;  %v120_v14 = vld [vmem:[%s4030_s2 + $0x2f0] sm:$0xff] }
  0x81   :  { %v261_v4 = vmul.f32 %v2761_v52, %v99_v1  ;;  %v268_v5 = vmul.f32 %v2761_v52, %v106_v25  ;;  %v102_v11 = vld [vmem:[%s4030_s2 + $0x260] sm:$0xff]  ;;  %v113_v13 = vld [vmem:[%s4030_s2 + $0x2b8] sm:$0xff]  ;;  %v260_v15 = vmul.f32 %v2763_v53, %v98_v8  ;;  %v267_v16 = vmul.f32 %v2763_v53, %v105_v10  ;;  %v112_v23 = vld [vmem:[%s4030_s2 + $0x2b0] sm:$0xff] }
  0x82   :  { %883 = vmatpush1.bf16.msra.mxu1 %v655_v58  ;;  %v254_v58 = vmul.f32 %v2761_v52, %v92_v49  ;;  %v264_v17 = vmul.f32 %v2765_v54, %v102_v11  ;;  %v271_v18 = vmul.f32 %v2765_v54, %v109_v12  ;;  %v275_v19 = vmul.f32 %v2761_v52, %v113_v13  ;;  %v119_v27 = vld [vmem:[%s4030_s2 + $0x2e8] sm:$0xff]  ;;  %v116_v28 = vld [vmem:[%s4030_s2 + $0x2d0] sm:$0xff]  ;;  %v134_v31 = vld [vmem:[%s4030_s2 + $0x360] sm:$0xff] }
  0x83   :  { %v282_v20 = vmul.f32 %v2761_v52, %v120_v14  ;;  %v123_v29 = vld [vmem:[%s4030_s2 + $0x308] sm:$0xff]  ;;  %v274_v42 = vmul.f32 %v2763_v53, %v112_v23  ;;  %v281_v43 = vmul.f32 %v2763_v53, %v119_v27  ;;  %v278_v32 = vmul.f32 %v2765_v54, %v116_v28  ;;  %v126_v44 = vld [vmem:[%s4030_s2 + $0x320] sm:$0xff]  ;;  %v133_v39 = vld [vmem:[%s4030_s2 + $0x358] sm:$0xff] }
  0x84   :  { %842 = vmatmul.mubr.bf16.gmra.mrb[32].mxu1 %v370_v59  ;;  %v337_v59 = vpack.c.bf16 %v239_v55, %v232_v50  ;;  %v127_v30 = vld [vmem:[%s4030_s2 + $0x328] sm:$0xff]  ;;  %v285_v33 = vmul.f32 %v2765_v54, %v123_v29  ;;  %v296_v35 = vmul.f32 %v2761_v52, %v134_v31  ;;  %v130_v40 = vld [vmem:[%s4030_s2 + $0x340] sm:$0xff]  ;;  %v137_v46 = vld [vmem:[%s4030_s2 + $0x378] sm:$0xff]  ;;  %v288_v50 = vmul.f32 %v2763_v53, %v126_v44 }
  0x85   :  { %1088 = vmatmul.mubr.bf16.gmra.mrb[32].mxu0 %v374_v61  ;;  %884 = vmatprep.mubr.bf16.mxu1 %v317_v45  ;;  %v341_v61 = vpack.c.bf16 %v243_v56, %v236_v51  ;;  %v345_v45 = vpack.c.bf16 %v254_v58, %v247_v57  ;;  %v289_v34 = vmul.f32 %v2761_v52, %v127_v30  ;;  %v141_v47 = vld [vmem:[%s4030_s2 + $0x398] sm:$0xff]  ;;  %v148_v49 = vld [vmem:[%s4030_s2 + $0x3d0] sm:$0xff]  ;;  %v147_v48 = vld [vmem:[%s4030_s2 + $0x3c8] sm:$0xff] }
  0x86   :  { %1130 = vmatprep.mubr.bf16.mxu0 %v2231_v60  ;;  %v295_v55 = vmul.f32 %v2763_v53, %v133_v39  ;;  %v292_v51 = vmul.f32 %v2765_v54, %v130_v40  ;;  %v299_v56 = vmul.f32 %v2765_v54, %v137_v46  ;;  %v303_v57 = vmul.f32 %v2761_v52, %v141_v47  ;;  %v140_v62 = vld [vmem:[%s4030_s2 + $0x390] sm:$0xff]  ;;  %v151_v0 = vld [vmem:[%s4030_s2 + $0x3e8] sm:$0xff] }
  0x87   :  { %v310_v58 = vmul.f32 %v2761_v52, %v148_v49  ;;  %v144_v63 = vld [vmem:[%s4030_s2 + $0x3b0] sm:$0xff]  ;;  %v302_v52 = vmul.f32 %v2763_v53, %v140_v62  ;;  %v309_v1 = vmul.f32 %v2763_v53, %v147_v48 }
  0x88   :  { %v306_v25 = vmul.f32 %v2765_v54, %v144_v63 }
  0x8c   :  { %885 = vmatmul.mubr.bf16.vlgmr.msra.gmra.mrb[0].mxu1 %v316_v6  ;;  %v344_v6 = vpack.c.bf16 %v253_v41, %v246_v26  ;;  %v313_v26 = vmul.f32 %v2765_v54, %v151_v0  ;;  %v372_v41 = vpack.c.bf16 %v309_v1, %v302_v52 }
  0x8d   :  { %2031 = vmatmul.mubr.msk.bf16.vlgmr.msra.gmra.mrb[0].mxu0 %vm701_vm0, %v320_v7  ;;  %894 = vmatprep.mubr.bf16.mxu1 %v324_v9  ;;  %v348_v7 = vpack.c.bf16 %v257_v3, %v250_v2  ;;  %v352_v9 = vpack.c.bf16 %v268_v5, %v261_v4 }
  0x8e   :  { %1140 = vmatprep.mubr.bf16.mxu0 %v2231_v60  ;;  %v376_v2 = vpack.c.bf16 %v313_v26, %v306_v25 }
  0x94   :  { %895 = vmatmul.mubr.bf16.gmra.mrb[4].mxu1 %v323_v21  ;;  %v351_v21 = vpack.c.bf16 %v267_v16, %v260_v15 }
  0x95   :  { %2032 = vmatmul.mubr.msk.bf16.gmra.mrb[4].mxu0 %vm701_vm0, %v327_v22  ;;  %904 = vmatprep.mubr.bf16.mxu1 %v331_v24  ;;  %v355_v22 = vpack.c.bf16 %v271_v18, %v264_v17  ;;  %v359_v24 = vpack.c.bf16 %v282_v20, %v275_v19 }
  0x96   :  { %1150 = vmatprep.mubr.bf16.mxu0 %v2231_v60 }
  0x9c   :  { %905 = vmatmul.mubr.bf16.gmra.mrb[8].mxu1 %v330_v36  ;;  %v358_v36 = vpack.c.bf16 %v281_v43, %v274_v42 }
  0x9d   :  { %2033 = vmatmul.mubr.msk.bf16.gmra.mrb[8].mxu0 %vm701_vm0, %v334_v37  ;;  %914 = vmatprep.mubr.bf16.mxu1 %v338_v38  ;;  %v362_v37 = vpack.c.bf16 %v285_v33, %v278_v32  ;;  %v366_v38 = vpack.c.bf16 %v296_v35, %v289_v34 }
  0x9e   :  { %1160 = vmatprep.mubr.bf16.mxu0 %v2231_v60 }
  0xa4   :  { %915 = vmatmul.mubr.bf16.gmra.mrb[12].mxu1 %v337_v59  ;;  %v365_v59 = vpack.c.bf16 %v295_v55, %v288_v50 }
  0xa5   :  { %2034 = vmatmul.mubr.msk.bf16.gmra.mrb[12].mxu0 %vm701_vm0, %v341_v61  ;;  %924 = vmatprep.mubr.bf16.mxu1 %v345_v45  ;;  %v369_v61 = vpack.c.bf16 %v299_v56, %v292_v51  ;;  %v373_v45 = vpack.c.bf16 %v310_v58, %v303_v57 }
  0xa6   :  { %1170 = vmatprep.mubr.bf16.mxu0 %v2231_v60 }
  0xac   :  { %925 = vmatmul.mubr.bf16.gmra.mrb[16].mxu1 %v344_v6 }
  0xad   :  { %2035 = vmatmul.mubr.msk.bf16.gmra.mrb[16].mxu0 %vm701_vm0, %v348_v7  ;;  %934 = vmatprep.mubr.bf16.mxu1 %v352_v9 }
  0xae   :  { %1180 = vmatprep.mubr.bf16.mxu0 %v2231_v60 }
  0xb4   :  { %935 = vmatmul.mubr.bf16.gmra.mrb[20].mxu1 %v351_v21 }
  0xb5   :  { %2036 = vmatmul.mubr.msk.bf16.gmra.mrb[20].mxu0 %vm701_vm0, %v355_v22  ;;  %944 = vmatprep.mubr.bf16.mxu1 %v359_v24 }
  0xb6   :  { %1190 = vmatprep.mubr.bf16.mxu0 %v2231_v60 }
  0xbc   :  { %945 = vmatmul.mubr.bf16.gmra.mrb[24].mxu1 %v358_v36 }
  0xbd   :  { %2037 = vmatmul.mubr.msk.bf16.gmra.mrb[24].mxu0 %vm701_vm0, %v362_v37  ;;  %954 = vmatprep.mubr.bf16.mxu1 %v366_v38 }
  0xbe   :  { %1200 = vmatprep.mubr.bf16.mxu0 %v2231_v60 }
  0xc4   :  { %955 = vmatmul.mubr.bf16.gmra.mrb[28].mxu1 %v365_v59 }
  0xc5   :  { %2038 = vmatmul.mubr.msk.bf16.gmra.mrb[28].mxu0 %vm701_vm0, %v369_v61  ;;  %964 = vmatprep.mubr.bf16.mxu1 %v373_v45 }
  0xc6   :  { %1210 = vmatprep.mubr.bf16.mxu0 %v2231_v60 }
  0xcc   :  { %965 = vmatmul.mubr.bf16.gmra.mrb[32].mxu1 %v372_v41 }
  0xcd   :  { %2039 = vmatmul.mubr.msk.bf16.gmra.mrb[32].mxu0 %vm701_vm0, %v376_v2 }
 0x15f   :  { %v886_v3 = vpop.f32.mrb[0].mxu1 }
 0x160   :  { %v1132_v4 = vpop.f32.mrb[0].mxu0  ;;  %v888_v6 = vpop.f32.mrb[1].mxu1 }
 0x161   :  { %v3484_v5 = vadd.f32 %v1132_v4, %v886_v3  ;;  %v1134_v7 = vpop.f32.mrb[1].mxu0  ;;  %v890_v8 = vpop.f32.mrb[2].mxu1 }
 0x162   :  { %v2041_v53 = vadd.f32 %v1134_v7, %v888_v6  ;;  %v1136_v9 = vpop.f32.mrb[2].mxu0  ;;  %v892_v54 = vpop.f32.mrb[3].mxu1 }
 0x163   :  { %v3486_v10 = vadd.f32 %v1136_v9, %v890_v8  ;;  %v1138_v11 = vpop.f32.mrb[3].mxu0  ;;  %v1366_v51 = vmul.f32 %v3484_v5, %v3484_v5 }
 0x164   :  { %1223 = vst.msk [vmem:[#allocation2 + $0x8] sm:$0xff] %vm1222_vm1, %v2041_v53  ;;  %v2043_v60 = vadd.f32 %v1138_v11, %v892_v54 }
 0x165   :  { %v1368_v43 = vmul.f32 %v3486_v10, %v3486_v10 }
 0x166   :  { %1225 = vst.msk [vmem:[#allocation2 + $0x18] sm:$0xff] %vm1222_vm1, %v2043_v60 }
 0x167   :  { %v896_v12 = vpop.f32.mrb[4].mxu1 }
 0x168   :  { %v1142_v13 = vpop.f32.mrb[4].mxu0  ;;  %v898_v15 = vpop.f32.mrb[5].mxu1 }
 0x169   :  { %v3490_v14 = vadd.f32 %v1142_v13, %v896_v12  ;;  %v1144_v16 = vpop.f32.mrb[5].mxu0  ;;  %v900_v18 = vpop.f32.mrb[6].mxu1 }
 0x16a   :  { %v2045_v17 = vadd.f32 %v1144_v16, %v898_v15  ;;  %v1146_v19 = vpop.f32.mrb[6].mxu0  ;;  %v902_v21 = vpop.f32.mrb[7].mxu1 }
 0x16b   :  { %v3492_v20 = vadd.f32 %v1146_v19, %v900_v18  ;;  %v1148_v22 = vpop.f32.mrb[7].mxu0  ;;  %v1259_v23 = vld [vmem:[#allocation2 + $0x8] sm:$0xff]  ;;  %v1370_v52 = vmul.f32 %v3490_v14, %v3490_v14 }
 0x16c   :  { %1227 = vst.msk [vmem:[#allocation2 + $0x28] sm:$0xff] %vm1222_vm1, %v2045_v17  ;;  %v2047_v24 = vadd.f32 %v1148_v22, %v902_v21  ;;  %v1294_v27 = vsel %vm1222_vm1, %v1259_v23, 0.0  ;;  %v1367_v42 = vmul.f32 %v1259_v23, %v1259_v23 }
 0x16d   :  { %v1295_v28 = vadd.f32 %v3484_v5, %v1294_v27  ;;  %v1261_v29 = vld [vmem:[#allocation2 + $0x18] sm:$0xff]  ;;  %v1372_v60 = vmul.f32 %v3492_v20, %v3492_v20 }
 0x16e   :  { %1229 = vst.msk [vmem:[#allocation2 + $0x38] sm:$0xff] %vm1222_vm1, %v2047_v24  ;;  %v1369_v30 = vmul.f32 %v1261_v29, %v1261_v29  ;;  %v1298_v31 = vsel %vm1222_vm1, %v1261_v29, 0.0  ;;  %v1402_v47 = vsel %vm1222_vm1, %v1367_v42, 0.0 }
 0x16f   :  { %1296 = vadd.xlane.f32.xlu0 %v1295_v28  ;;  %v906_v32 = vpop.f32.mrb[8].mxu1  ;;  %v1299_v38 = vadd.f32 %v3486_v10, %v1298_v31  ;;  %v1403_v61 = vadd.f32 %v1402_v47, %v1366_v51 }
 0x170   :  { %v1152_v33 = vpop.f32.mrb[8].mxu0  ;;  %v1406_v34 = vsel %vm1222_vm1, %v1369_v30, 0.0  ;;  %v908_v36 = vpop.f32.mrb[9].mxu1 }
 0x171   :  { %v3502_v35 = vadd.f32 %v1152_v33, %v906_v32  ;;  %v1154_v37 = vpop.f32.mrb[9].mxu0  ;;  %v1407_v44 = vadd.f32 %v1406_v34, %v1368_v43  ;;  %v910_v40 = vpop.f32.mrb[10].mxu1 }
 0x172   :  { %v2049_v39 = vadd.f32 %v1154_v37, %v908_v36  ;;  %v1156_v46 = vpop.f32.mrb[10].mxu0  ;;  %v912_v55 = vpop.f32.mrb[11].mxu1 }
 0x173   :  { %v3506_v49 = vadd.f32 %v1156_v46, %v910_v40  ;;  %v1158_v50 = vpop.f32.mrb[11].mxu0  ;;  %1408 = vadd.xlane.f32.xlu1 %v1407_v44  ;;  %1300 = vadd.xlane.f32.xlu0 %v1299_v38  ;;  %v1263_v56 = vld [vmem:[#allocation2 + $0x28] sm:$0xff]  ;;  %v1374_v24 = vmul.f32 %v3502_v35, %v3502_v35 }
 0x174   :  { %1231 = vst.msk [vmem:[#allocation2 + $0x48] sm:$0xff] %vm1222_vm1, %v2049_v39  ;;  %v2051_v57 = vadd.f32 %v1158_v50, %v912_v55  ;;  %v1302_v58 = vsel %vm1222_vm1, %v1263_v56, 0.0  ;;  %v1371_v59 = vmul.f32 %v1263_v56, %v1263_v56 }
 0x175   :  { %v1303_v62 = vadd.f32 %v3490_v14, %v1302_v58  ;;  %v1265_v45 = vld [vmem:[#allocation2 + $0x38] sm:$0xff]  ;;  %v1376_v39 = vmul.f32 %v3506_v49, %v3506_v49 }
 0x176   :  { %1233 = vst.msk [vmem:[#allocation2 + $0x58] sm:$0xff] %vm1222_vm1, %v2051_v57  ;;  %v1410_v48 = vsel %vm1222_vm1, %v1371_v59, 0.0  ;;  %v1306_v63 = vsel %vm1222_vm1, %v1265_v45, 0.0  ;;  %v1373_v0 = vmul.f32 %v1265_v45, %v1265_v45 }
 0x177   :  { %1404 = vadd.xlane.f32.xlu0 %v1403_v61  ;;  %1304 = vadd.xlane.f32.xlu1 %v1303_v62  ;;  %v916_v1 = vpop.f32.mrb[12].mxu1  ;;  %v1411_v3 = vadd.f32 %v1410_v48, %v1370_v52  ;;  %v1307_v4 = vadd.f32 %v3492_v20, %v1306_v63 }
 0x178   :  { %v1162_v25 = vpop.f32.mrb[12].mxu0  ;;  %v918_v41 = vpop.f32.mrb[13].mxu1  ;;  %v1414_v8 = vsel %vm1222_vm1, %v1373_v0, 0.0 }
 0x179   :  { %v3518_v26 = vadd.f32 %v1162_v25, %v916_v1  ;;  %v1164_v2 = vpop.f32.mrb[13].mxu0  ;;  %v920_v7 = vpop.f32.mrb[14].mxu1  ;;  %v1415_v17 = vadd.f32 %v1414_v8, %v1372_v60 }
 0x17a   :  { %v2053_v6 = vadd.f32 %v1164_v2, %v918_v41  ;;  %v1166_v53 = vpop.f32.mrb[14].mxu0  ;;  %v922_v11 = vpop.f32.mrb[15].mxu1 }
 0x17b   :  { %v3522_v9 = vadd.f32 %v1166_v53, %v920_v7  ;;  %v1168_v54 = vpop.f32.mrb[15].mxu0  ;;  %1412 = vadd.xlane.f32.xlu0 %v1411_v3  ;;  %1308 = vadd.xlane.f32.xlu1 %v1307_v4  ;;  %v1267_v12 = vld [vmem:[#allocation2 + $0x48] sm:$0xff]  ;;  %v1378_v61 = vmul.f32 %v3518_v26, %v3518_v26 }
 0x17c   :  { %1235 = vst.msk [vmem:[#allocation2 + $0x68] sm:$0xff] %vm1222_vm1, %v2053_v6  ;;  %v2055_v13 = vadd.f32 %v1168_v54, %v922_v11  ;;  %v1310_v15 = vsel %vm1222_vm1, %v1267_v12, 0.0  ;;  %v1375_v16 = vmul.f32 %v1267_v12, %v1267_v12 }
 0x17d   :  { %v1311_v18 = vadd.f32 %v3502_v35, %v1310_v15  ;;  %v1269_v19 = vld [vmem:[#allocation2 + $0x58] sm:$0xff]  ;;  %v1380_v53 = vmul.f32 %v3522_v9, %v3522_v9 }
 0x17e   :  { %1237 = vst.msk [vmem:[#allocation2 + $0x78] sm:$0xff] %vm1222_vm1, %v2055_v13  ;;  %v1418_v21 = vsel %vm1222_vm1, %v1375_v16, 0.0  ;;  %v1314_v22 = vsel %vm1222_vm1, %v1269_v19, 0.0  ;;  %v1377_v23 = vmul.f32 %v1269_v19, %v1269_v19 }
 0x17f   :  { %1416 = vadd.xlane.f32.xlu1 %v1415_v17  ;;  %1312 = vadd.xlane.f32.xlu0 %v1311_v18  ;;  %v926_v27 = vpop.f32.mrb[16].mxu1  ;;  %v1419_v42 = vadd.f32 %v1418_v21, %v1374_v24  ;;  %v1315_v43 = vadd.f32 %v3506_v49, %v1314_v22 }
 0x180   :  { %v1172_v28 = vpop.f32.mrb[16].mxu0  ;;  %v928_v30 = vpop.f32.mrb[17].mxu1  ;;  %v1422_v36 = vsel %vm1222_vm1, %v1377_v23, 0.0 }
 0x181   :  { %v3534_v29 = vadd.f32 %v1172_v28, %v926_v27  ;;  %v1174_v31 = vpop.f32.mrb[17].mxu0  ;;  %v930_v33 = vpop.f32.mrb[18].mxu1  ;;  %v1423_v55 = vadd.f32 %v1422_v36, %v1376_v39 }
 0x182   :  { %v2057_v32 = vadd.f32 %v1174_v31, %v928_v30  ;;  %v1176_v34 = vpop.f32.mrb[18].mxu0  ;;  %v932_v38 = vpop.f32.mrb[19].mxu1 }
 0x183   :  { %v3538_v37 = vadd.f32 %v1176_v34, %v930_v33  ;;  %v1178_v44 = vpop.f32.mrb[19].mxu0  ;;  %1420 = vadd.xlane.f32.xlu0 %v1419_v42  ;;  %1316 = vadd.xlane.f32.xlu1 %v1315_v43  ;;  %v1271_v40 = vld [vmem:[#allocation2 + $0x68] sm:$0xff]  ;;  %v1382_v19 = vmul.f32 %v3534_v29, %v3534_v29 }
 0x184   :  { %1239 = vst.msk [vmem:[#allocation2 + $0x88] sm:$0xff] %vm1222_vm1, %v2057_v32  ;;  %v2059_v46 = vadd.f32 %v1178_v44, %v932_v38  ;;  %v1318_v47 = vsel %vm1222_vm1, %v1271_v40, 0.0  ;;  %v1379_v50 = vmul.f32 %v1271_v40, %v1271_v40 }
 0x185   :  { %v1319_v51 = vadd.f32 %v3518_v26, %v1318_v47  ;;  %v1273_v56 = vld [vmem:[#allocation2 + $0x78] sm:$0xff]  ;;  %v1384_v44 = vmul.f32 %v3538_v37, %v3538_v37 }
 0x186   :  { %1241 = vst.msk [vmem:[#allocation2 + $0x98] sm:$0xff] %vm1222_vm1, %v2059_v46  ;;  %v1426_v57 = vsel %vm1222_vm1, %v1379_v50, 0.0  ;;  %v1322_v58 = vsel %vm1222_vm1, %v1273_v56, 0.0  ;;  %v1381_v59 = vmul.f32 %v1273_v56, %v1273_v56 }
 0x187   :  { %1424 = vadd.xlane.f32.xlu1 %v1423_v55  ;;  %1320 = vadd.xlane.f32.xlu0 %v1319_v51  ;;  %v936_v62 = vpop.f32.mrb[20].mxu1  ;;  %v1427_v52 = vadd.f32 %v1426_v57, %v1378_v61  ;;  %v1323_v1 = vadd.f32 %v3522_v9, %v1322_v58 }
 0x188   :  { %v1182_v45 = vpop.f32.mrb[20].mxu0  ;;  %v938_v63 = vpop.f32.mrb[21].mxu1  ;;  %v1430_v3 = vsel %vm1222_vm1, %v1381_v59, 0.0 }
 0x189   :  { %v3550_v48 = vadd.f32 %v1182_v45, %v936_v62  ;;  %v1184_v0 = vpop.f32.mrb[21].mxu0  ;;  %v940_v41 = vpop.f32.mrb[22].mxu1  ;;  %v1431_v12 = vadd.f32 %v1430_v3, %v1380_v53 }
 0x18a   :  { %v2061_v25 = vadd.f32 %v1184_v0, %v938_v63  ;;  %v1186_v2 = vpop.f32.mrb[22].mxu0  ;;  %v942_v7 = vpop.f32.mrb[23].mxu1 }
 0x18b   :  { %v3554_v4 = vadd.f32 %v1186_v2, %v940_v41  ;;  %v1188_v6 = vpop.f32.mrb[23].mxu0  ;;  %1428 = vadd.xlane.f32.xlu0 %v1427_v52  ;;  %1324 = vadd.xlane.f32.xlu1 %v1323_v1  ;;  %v3558_v8 = vld [vmem:[#allocation2 + $0x88] sm:$0xff]  ;;  %v1386_v58 = vmul.f32 %v3550_v48, %v3550_v48 }
 0x18c   :  { %1243 = vst.msk [vmem:[#allocation2 + $0xa8] sm:$0xff] %vm1222_vm1, %v2061_v25  ;;  %v2063_v54 = vadd.f32 %v1188_v6, %v942_v7  ;;  %v1326_v11 = vsel %vm1222_vm1, %v3558_v8, 0.0  ;;  %v1383_v60 = vmul.f32 %v3558_v8, %v3558_v8 }
 0x18d   :  { %v1327_v13 = vadd.f32 %v3534_v29, %v1326_v11  ;;  %v1277_v15 = vld [vmem:[#allocation2 + $0x98] sm:$0xff]  ;;  %v1388_v53 = vmul.f32 %v3554_v4, %v3554_v4 }
 0x18e   :  { %1245 = vst.msk [vmem:[#allocation2 + $0xb8] sm:$0xff] %vm1222_vm1, %v2063_v54  ;;  %v1434_v16 = vsel %vm1222_vm1, %v1383_v60, 0.0  ;;  %v1330_v17 = vsel %vm1222_vm1, %v1277_v15, 0.0  ;;  %v1385_v18 = vmul.f32 %v1277_v15, %v1277_v15 }
 0x18f   :  { %1432 = vadd.xlane.f32.xlu1 %v1431_v12  ;;  %1328 = vadd.xlane.f32.xlu0 %v1327_v13  ;;  %v946_v21 = vpop.f32.mrb[24].mxu1  ;;  %v1435_v28 = vadd.f32 %v1434_v16, %v1382_v19  ;;  %v1331_v30 = vadd.f32 %v3538_v37, %v1330_v17 }
 0x190   :  { %v1192_v22 = vpop.f32.mrb[24].mxu0  ;;  %v948_v24 = vpop.f32.mrb[25].mxu1  ;;  %v1438_v32 = vsel %vm1222_vm1, %v1385_v18, 0.0 }
 0x191   :  { %v3571_v23 = vadd.f32 %v1192_v22, %v946_v21  ;;  %v1194_v27 = vpop.f32.mrb[25].mxu0  ;;  %v950_v42 = vpop.f32.mrb[26].mxu1  ;;  %v1439_v47 = vadd.f32 %v1438_v32, %v1384_v44 }
 0x192   :  { %v2065_v31 = vadd.f32 %v1194_v27, %v948_v24  ;;  %v1196_v43 = vpop.f32.mrb[26].mxu0  ;;  %v952_v36 = vpop.f32.mrb[27].mxu1 }
 0x193   :  { %v3575_v33 = vadd.f32 %v1196_v43, %v950_v42  ;;  %v1198_v34 = vpop.f32.mrb[27].mxu0  ;;  %1436 = vadd.xlane.f32.xlu0 %v1435_v28  ;;  %1332 = vadd.xlane.f32.xlu1 %v1331_v30  ;;  %v3579_v38 = vld [vmem:[#allocation2 + $0xa8] sm:$0xff]  ;;  %v1390_v21 = vmul.f32 %v3571_v23, %v3571_v23 }
 0x194   :  { %1247 = vst.msk [vmem:[#allocation2 + $0xc8] sm:$0xff] %vm1222_vm1, %v2065_v31  ;;  %v2067_v39 = vadd.f32 %v1198_v34, %v952_v36  ;;  %v1334_v40 = vsel %vm1222_vm1, %v3579_v38, 0.0  ;;  %v1387_v46 = vmul.f32 %v3579_v38, %v3579_v38 }
 0x195   :  { %v1335_v50 = vadd.f32 %v3550_v48, %v1334_v40  ;;  %v3587_v55 = vld [vmem:[#allocation2 + $0xb8] sm:$0xff] }
 0x196   :  { %1249 = vst.msk [vmem:[#allocation2 + $0xd8] sm:$0xff] %vm1222_vm1, %v2067_v39  ;;  %v1442_v51 = vsel %vm1222_vm1, %v1387_v46, 0.0  ;;  %v1338_v56 = vsel %vm1222_vm1, %v3587_v55, 0.0  ;;  %v1389_v57 = vmul.f32 %v3587_v55, %v3587_v55  ;;  %v1392_v46 = vmul.f32 %v3575_v33, %v3575_v33 }
 0x197   :  { %1440 = vadd.xlane.f32.xlu1 %v1439_v47  ;;  %1336 = vadd.xlane.f32.xlu0 %v1335_v50  ;;  %v956_v59 = vpop.f32.mrb[28].mxu1  ;;  %v1443_v0 = vadd.f32 %v1442_v51, %v1386_v58  ;;  %v1339_v52 = vadd.f32 %v3554_v4, %v1338_v56 }
 0x198   :  { %v1202_v61 = vpop.f32.mrb[28].mxu0  ;;  %v958_v45 = vpop.f32.mrb[29].mxu1  ;;  %v1446_v2 = vsel %vm1222_vm1, %v1389_v57, 0.0 }
 0x199   :  { %v3597_v62 = vadd.f32 %v1202_v61, %v956_v59  ;;  %v1204_v63 = vpop.f32.mrb[29].mxu0  ;;  %v960_v25 = vpop.f32.mrb[30].mxu1  ;;  %v1447_v13 = vadd.f32 %v1446_v2, %v1388_v53 }
 0x19a   :  { %v2069_v1 = vadd.f32 %v1204_v63, %v958_v45  ;;  %v1206_v41 = vpop.f32.mrb[30].mxu0  ;;  %v962_v7 = vpop.f32.mrb[31].mxu1 }
 0x19b   :  { %v3601_v3 = vadd.f32 %v1206_v41, %v960_v25  ;;  %v1208_v6 = vpop.f32.mrb[31].mxu0  ;;  %1444 = vadd.xlane.f32.xlu0 %v1443_v0  ;;  %1340 = vadd.xlane.f32.xlu1 %v1339_v52  ;;  %v3605_v54 = vld [vmem:[#allocation2 + $0xc8] sm:$0xff]  ;;  %v1394_v0 = vmul.f32 %v3597_v62, %v3597_v62 }
 0x19c   :  { %1251 = vst.msk [vmem:[#allocation2 + $0xe8] sm:$0xff] %vm1222_vm1, %v2069_v1  ;;  %v2071_v11 = vadd.f32 %v1208_v6, %v962_v7  ;;  %v1342_v60 = vsel %vm1222_vm1, %v3605_v54, 0.0  ;;  %v1391_v12 = vmul.f32 %v3605_v54, %v3605_v54 }
 0x19d   :  { %v1343_v15 = vadd.f32 %v3571_v23, %v1342_v60  ;;  %v3613_v16 = vld [vmem:[#allocation2 + $0xd8] sm:$0xff]  ;;  %v1396_v41 = vmul.f32 %v3601_v3, %v3601_v3 }
 0x19e   :  { %1253 = vst.msk [vmem:[#allocation2 + $0xf8] sm:$0xff] %vm1222_vm1, %v2071_v11  ;;  %v1450_v17 = vsel %vm1222_vm1, %v1391_v12, 0.0  ;;  %v1346_v18 = vsel %vm1222_vm1, %v3613_v16, 0.0  ;;  %v1393_v19 = vmul.f32 %v3613_v16, %v3613_v16 }
 0x19f   :  { %1448 = vadd.xlane.f32.xlu1 %v1447_v13  ;;  %1344 = vadd.xlane.f32.xlu0 %v1343_v15  ;;  %v966_v22 = vpop.f32.mrb[32].mxu1  ;;  %v1451_v31 = vadd.f32 %v1450_v17, %v1390_v21  ;;  %v1347_v42 = vadd.f32 %v3575_v33, %v1346_v18 }
 0x1a0   :  { %v1212_v24 = vpop.f32.mrb[32].mxu0  ;;  %v968_v28 = vpop.f32.mrb[33].mxu1  ;;  %v1454_v36 = vsel %vm1222_vm1, %v1393_v19, 0.0 }
 0x1a1   :  { %v3623_v27 = vadd.f32 %v1212_v24, %v966_v22  ;;  %v1214_v30 = vpop.f32.mrb[33].mxu0  ;;  %v970_v32 = vpop.f32.mrb[34].mxu1  ;;  %v1455_v57 = vadd.f32 %v1454_v36, %v1392_v46 }
 0x1a2   :  { %v2073_v43 = vadd.f32 %v1214_v30, %v968_v28  ;;  %v1216_v34 = vpop.f32.mrb[34].mxu0  ;;  %v972_v40 = vpop.f32.mrb[35].mxu1 }
 0x1a3   :  { %v3627_v44 = vadd.f32 %v1216_v34, %v970_v32  ;;  %v1218_v39 = vpop.f32.mrb[35].mxu0  ;;  %1452 = vadd.xlane.f32.xlu0 %v1451_v31  ;;  %1348 = vadd.xlane.f32.xlu1 %v1347_v42  ;;  %v3631_v47 = vld [vmem:[#allocation2 + $0xe8] sm:$0xff]  ;;  %v1398_v17 = vmul.f32 %v3623_v27, %v3623_v27 }
 0x1a4   :  { %1255 = vst.msk [vmem:[#allocation2 + $0x108] sm:$0xff] %vm1222_vm1, %v2073_v43  ;;  %v2075_v50 = vadd.f32 %v1218_v39, %v972_v40  ;;  %v1350_v51 = vsel %vm1222_vm1, %v3631_v47, 0.0  ;;  %v1395_v56 = vmul.f32 %v3631_v47, %v3631_v47 }
 0x1a5   :  { %4036 = vst [vmem:[#allocation5_spill] sm:$0xff] %v3627_v44  ;;  %v1351_v58 = vadd.f32 %v3597_v62, %v1350_v51  ;;  %v3639_v59 = vld [vmem:[#allocation2 + $0xf8] sm:$0xff]  ;;  %v1400_v22 = vmul.f32 %v3627_v44, %v3627_v44 }
 0x1a6   :  { %1257 = vst.msk [vmem:[#allocation2 + $0x118] sm:$0xff] %vm1222_vm1, %v2075_v50  ;;  %v1458_v61 = vsel %vm1222_vm1, %v1395_v56, 0.0  ;;  %v1354_v45 = vsel %vm1222_vm1, %v3639_v59, 0.0  ;;  %v1397_v63 = vmul.f32 %v3639_v59, %v3639_v59 }
 0x1a7   :  { %1456 = vadd.xlane.f32.xlu1 %v1455_v57  ;;  %1352 = vadd.xlane.f32.xlu0 %v1351_v58  ;;  %v1459_v52 = vadd.f32 %v1458_v61, %v1394_v0  ;;  %v1355_v1 = vadd.f32 %v3601_v3, %v1354_v45 }
 0x1a8   :  { %v1462_v25 = vsel %vm1222_vm1, %v1397_v63, 0.0 }
 0x1a9   :  { %v1463_v53 = vadd.f32 %v1462_v25, %v1396_v41 }
 0x1ab   :  { %1460 = vadd.xlane.f32.xlu0 %v1459_v52  ;;  %1356 = vadd.xlane.f32.xlu1 %v1355_v1  ;;  %v3653_v2 = vld [vmem:[#allocation2 + $0x108] sm:$0xff] }
 0x1ac   :  { %4037 = vst [vmem:[#allocation6_spill] sm:$0xff] %v3653_v2  ;;  %v1358_v6 = vsel %vm1222_vm1, %v3653_v2, 0.0  ;;  %v1399_v7 = vmul.f32 %v3653_v2, %v3653_v2 }
 0x1ad   :  { %v1359_v11 = vadd.f32 %v3623_v27, %v1358_v6  ;;  %v3660_v60 = vld [vmem:[#allocation2 + $0x118] sm:$0xff] }
 0x1ae   :  { %4038 = vst [vmem:[#allocation7_spill] sm:$0xff] %v3660_v60  ;;  %v1466_v12 = vsel %vm1222_vm1, %v1399_v7, 0.0  ;;  %v1362_v13 = vsel %vm1222_vm1, %v3660_v60, 0.0  ;;  %v1401_v15 = vmul.f32 %v3660_v60, %v3660_v60 }
 0x1af   :  { %1464 = vadd.xlane.f32.xlu1 %v1463_v53  ;;  %1360 = vadd.xlane.f32.xlu0 %v1359_v11  ;;  %v1467_v18 = vadd.f32 %v1466_v12, %v1398_v17  ;;  %v1363_v19 = vadd.f32 %v3627_v44, %v1362_v13  ;;  %v3690_v13 = vld [vmem:[%s4031_s3 + $0x8] sm:$0xff] }
 0x1b0   :  { %v1470_v21 = vsel %vm1222_vm1, %v1401_v15, 0.0 }
 0x1b1   :  { %v1471_v24 = vadd.f32 %v1470_v21, %v1400_v22 }
 0x1b3   :  { %1468 = vadd.xlane.f32.xlu0 %v1467_v18  ;;  %1364 = vadd.xlane.f32.xlu1 %v1363_v19 }
 0x1b7   :  { %1472 = vadd.xlane.f32.xlu1 %v1471_v24 }
 0x1fc   :  { %v1297_v28 = vpop.xlane.xlu0 %1296 }
 0x1fd   :  { %v3673_v42 = vmul.f32 0.0051020407, %v1297_v28 }
 0x1ff   :  { %v1510_v40 = vmul.f32 %v3673_v42, %v3673_v42 }
 0x200   :  { %v1409_v30 = vpop.xlane.xlu1 %1408  ;;  %v1301_v31 = vpop.xlane.xlu0 %1300 }
 0x201   :  { %v1475_v43 = vmul.f32 0.0051020407, %v1301_v31  ;;  %v1493_v32 = vmul.f32 0.0051020407, %v1409_v30  ;;  %v3699_v30 = vld [vmem:[%s4031_s3] sm:$0xff] }
 0x203   :  { %v1511_v34 = vmul.f32 %v1475_v43, %v1475_v43 }
 0x204   :  { %v1405_v36 = vpop.xlane.xlu0 %1404  ;;  %v1305_v39 = vpop.xlane.xlu1 %1304 }
 0x205   :  { %v1529_v46 = vsub.f32 %v1493_v32, %v1511_v34  ;;  %v1492_v50 = vmul.f32 0.0051020407, %v1405_v36  ;;  %v3677_v51 = vmul.f32 0.0051020407, %v1305_v39 }
 0x207   :  { %v1565_v56 = vadd.f32 1e-05, %v1529_v46  ;;  %v1528_v57 = vsub.f32 %v1492_v50, %v1510_v40  ;;  %v1512_v58 = vmul.f32 %v3677_v51, %v3677_v51 }
 0x208   :  { %v1413_v61 = vpop.xlane.xlu0 %1412  ;;  %v1309_v45 = vpop.xlane.xlu1 %1308 }
 0x209   :  { %2162 = vrsqrt.f32 %v1565_v56  ;;  %v1564_v63 = vadd.f32 1e-05, %v1528_v57  ;;  %v1494_v0 = vmul.f32 0.0051020407, %v1413_v61  ;;  %v3681_v52 = vmul.f32 0.0051020407, %v1309_v45 }
 0x20b   :  { %2164 = vrsqrt.f32 %v1564_v63  ;;  %v1530_v1 = vsub.f32 %v1494_v0, %v1512_v58  ;;  %v1513_v7 = vmul.f32 %v3681_v52, %v3681_v52  ;;  %v3710_v63 = vld [vmem:[%s4031_s3 + $0x10] sm:$0xff] }
 0x20c   :  { %v1417_v25 = vpop.xlane.xlu1 %1416  ;;  %v1313_v41 = vpop.xlane.xlu0 %1312 }
 0x20d   :  { %v1566_v6 = vadd.f32 1e-05, %v1530_v1  ;;  %v1495_v53 = vmul.f32 0.0051020407, %v1417_v25  ;;  %v3685_v11 = vmul.f32 0.0051020407, %v1313_v41 }
 0x20f   :  { %2166 = vrsqrt.f32 %v1566_v6  ;;  %v1531_v12 = vsub.f32 %v1495_v53, %v1513_v7  ;;  %v1514_v19 = vmul.f32 %v3685_v11, %v3685_v11  ;;  %v3721_v53 = vld [vmem:[%s4031_s3 + $0x18] sm:$0xff] }
 0x210   :  { %v1421_v15 = vpop.xlane.xlu0 %1420  ;;  %v1317_v17 = vpop.xlane.xlu1 %1316 }
 0x211   :  { %v1567_v18 = vadd.f32 1e-05, %v1531_v12  ;;  %v1496_v21 = vmul.f32 0.0051020407, %v1421_v15  ;;  %v3694_v22 = vmul.f32 0.0051020407, %v1317_v17 }
 0x213   :  { %v2163_v24 = vpop.eup %2162  ;;  %2168 = vrsqrt.f32 %v1567_v18  ;;  %v1532_v28 = vsub.f32 %v1496_v21, %v1514_v19  ;;  %v1515_v40 = vmul.f32 %v3694_v22, %v3694_v22 }
 0x214   :  { %v1601_v31 = vmul.f32 %v2163_v24, %v3690_v13  ;;  %v1425_v32 = vpop.xlane.xlu1 %1424  ;;  %v1321_v34 = vpop.xlane.xlu0 %1320 }
 0x215   :  { %v2165_v36 = vpop.eup %2164  ;;  %v1568_v39 = vadd.f32 1e-05, %v1532_v28  ;;  %v1497_v46 = vmul.f32 0.0051020407, %v1425_v32  ;;  %v3704_v50 = vmul.f32 0.0051020407, %v1321_v34 }
 0x216   :  { %1733 = vperm.xlu1 %2155, %v1601_v31   ;;  %v1600_v56 = vmul.f32 %v2165_v36, %v3699_v30  ;;  %v1619_v58 = vmul.f32 %v1601_v31, %v1475_v43  ;;  %v3733_v32 = vld [vmem:[%s4031_s3 + $0x20] sm:$0xff] }
 0x217   :  { %2170 = vrsqrt.f32 %v1568_v39  ;;  %v1533_v57 = vsub.f32 %v1497_v46, %v1515_v40  ;;  %v1516_v25 = vmul.f32 %v3704_v50, %v3704_v50 }
 0x218   :  { %v1429_v61 = vpop.xlane.xlu0 %1428  ;;  %v1325_v45 = vpop.xlane.xlu1 %1324  ;;  %1728 = vperm.xlu0 %2154, %v1600_v56   ;;  %v1618_v43 = vmul.f32 %v1600_v56, %v3673_v42 }
 0x219   :  { %v2167_v0 = vpop.eup %2166  ;;  %v1569_v1 = vadd.f32 1e-05, %v1533_v57  ;;  %v1498_v41 = vmul.f32 0.0051020407, %v1429_v61  ;;  %v3714_v6 = vmul.f32 0.0051020407, %v1325_v45 }
 0x21a   :  { %1656 = vrot.lane.b32.xlu1 %v1619_v58, %s2232_s8  ;;  %v1602_v17 = vmul.f32 %v2167_v0, %v3710_v63 }
 0x21b   :  { %2172 = vrsqrt.f32 %v1569_v1  ;;  %v1534_v7 = vsub.f32 %v1498_v41, %v1516_v25  ;;  %v1517_v21 = vmul.f32 %v3714_v6, %v3714_v6  ;;  %v3747_v41 = vld [vmem:[%s4031_s3 + $0x28] sm:$0xff] }
 0x21c   :  { %v1433_v12 = vpop.xlane.xlu1 %1432  ;;  %v1329_v15 = vpop.xlane.xlu0 %1328  ;;  %1654 = vrot.lane.b32.xlu0 %v1618_v43, %s2232_s8  ;;  %v1620_v39 = vmul.f32 %v1602_v17, %v3677_v51 }
 0x21d   :  { %v2169_v18 = vpop.eup %2168  ;;  %v1570_v19 = vadd.f32 1e-05, %v1534_v7  ;;  %v1499_v24 = vmul.f32 0.0051020407, %v1433_v12  ;;  %v3727_v42 = vmul.f32 0.0051020407, %v1329_v15 }
 0x21e   :  { %1738 = vperm.xlu1 %2155, %v1602_v17   ;;  %v1603_v28 = vmul.f32 %v2169_v18, %v3721_v53 }
 0x21f   :  { %2174 = vrsqrt.f32 %v1570_v19  ;;  %v1535_v31 = vsub.f32 %v1499_v24, %v1517_v21  ;;  %v1518_v56 = vmul.f32 %v3727_v42, %v3727_v42 }
 0x220   :  { %v1437_v34 = vpop.xlane.xlu0 %1436  ;;  %v1333_v36 = vpop.xlane.xlu1 %1332  ;;  %1743 = vperm.xlu0 %2154, %v1603_v28   ;;  %v1621_v51 = vmul.f32 %v1603_v28, %v3681_v52  ;;  %v3758_v52 = vld [vmem:[%s4031_s3 + $0x30] sm:$0xff] }
 0x221   :  { %v2171_v40 = vpop.eup %2170  ;;  %v1571_v46 = vadd.f32 1e-05, %v1535_v31  ;;  %v1500_v57 = vmul.f32 0.0051020407, %v1437_v34  ;;  %v3738_v58 = vmul.f32 0.0051020407, %v1333_v36 }
 0x222   :  { %1658 = vrot.lane.b32.xlu1 %v1620_v39, %s2232_s8  ;;  %v1604_v61 = vmul.f32 %v2171_v40, %v3733_v32 }
 0x223   :  { %2176 = vrsqrt.f32 %v1571_v46  ;;  %v1536_v45 = vsub.f32 %v1500_v57, %v1518_v56  ;;  %v1519_v12 = vmul.f32 %v3738_v58, %v3738_v58 }
 0x224   :  { %v1441_v0 = vpop.xlane.xlu1 %1440  ;;  %v1337_v1 = vpop.xlane.xlu0 %1336  ;;  %v1622_v25 = vmul.f32 %v1604_v61, %v3685_v11 }
 0x225   :  { %v2173_v43 = vpop.eup %2172  ;;  %v1572_v7 = vadd.f32 1e-05, %v1536_v45  ;;  %v1501_v15 = vmul.f32 0.0051020407, %v1441_v0  ;;  %v3751_v17 = vmul.f32 0.0051020407, %v1337_v1 }
 0x226   :  { %1662 = vrot.lane.b32.xlu0 %v1622_v25, %s2232_s8  ;;  %1660 = vrot.lane.b32.xlu1 %v1621_v51, %s2232_s8  ;;  %v1605_v21 = vmul.f32 %v2173_v43, %v3747_v41  ;;  %v3771_v0 = vld [vmem:[%s4031_s3 + $0x38] sm:$0xff] }
 0x227   :  { %2178 = vrsqrt.f32 %v1572_v7  ;;  %v1537_v11 = vsub.f32 %v1501_v15, %v1519_v12  ;;  %v1520_v31 = vmul.f32 %v3751_v17, %v3751_v17 }
 0x228   :  { %v1445_v18 = vpop.xlane.xlu0 %1444  ;;  %v1341_v19 = vpop.xlane.xlu1 %1340  ;;  %v1623_v45 = vmul.f32 %v1605_v21, %v3694_v22  ;;  %v3782_v22 = vld [vmem:[%s4031_s3 + $0x40] sm:$0xff] }
 0x229   :  { %v2175_v24 = vpop.eup %2174  ;;  %v1573_v28 = vadd.f32 1e-05, %v1537_v11  ;;  %v1502_v34 = vmul.f32 0.0051020407, %v1445_v18  ;;  %v3763_v36 = vmul.f32 0.0051020407, %v1341_v19 }
 0x22a   :  { %1753 = vperm.xlu0 %2154, %v1605_v21   ;;  %1748 = vperm.xlu1 %2155, %v1604_v61   ;;  %v1606_v39 = vmul.f32 %v2175_v24, %v3758_v52 }
 0x22b   :  { %2180 = vrsqrt.f32 %v1573_v28  ;;  %v1538_v40 = vsub.f32 %v1502_v34, %v1520_v31  ;;  %v1521_v61 = vmul.f32 %v3763_v36, %v3763_v36  ;;  %v3797_v34 = vld [vmem:[%s4031_s3 + $0x48] sm:$0xff] }
 0x22c   :  { %v1449_v46 = vpop.xlane.xlu1 %1448  ;;  %v1345_v56 = vpop.xlane.xlu0 %1344  ;;  %v1624_v57 = vmul.f32 %v1606_v39, %v3704_v50 }
 0x22d   :  { %v2177_v1 = vpop.eup %2176  ;;  %v1574_v25 = vadd.f32 1e-05, %v1538_v40  ;;  %v1503_v51 = vmul.f32 0.0051020407, %v1449_v46  ;;  %v3775_v43 = vmul.f32 0.0051020407, %v1345_v56 }
 0x22e   :  { %1666 = vrot.lane.b32.xlu0 %v1624_v57, %s2232_s8  ;;  %1664 = vrot.lane.b32.xlu1 %v1623_v45, %s2232_s8  ;;  %v3785_v15 = vmul.f32 %v2177_v1, %v3771_v0 }
 0x22f   :  { %2182 = vrsqrt.f32 %v1574_v25  ;;  %v1539_v50 = vsub.f32 %v1503_v51, %v1521_v61  ;;  %v1522_v19 = vmul.f32 %v3775_v43, %v3775_v43 }
 0x230   :  { %v1453_v7 = vpop.xlane.xlu0 %1452  ;;  %v1349_v12 = vpop.xlane.xlu1 %1348  ;;  %v1625_v57 = vmul.f32 %v3785_v15, %v3714_v6  ;;  %v3815_v6 = vld [vmem:[%s4031_s3 + $0x50] sm:$0xff] }
 0x231   :  { %v2179_v11 = vpop.eup %2178  ;;  %v1575_v18 = vadd.f32 1e-05, %v1539_v50  ;;  %v1504_v21 = vmul.f32 0.0051020407, %v1453_v7  ;;  %v3789_v24 = vmul.f32 0.0051020407, %v1349_v12 }
 0x232   :  { %1758 = vperm.xlu1 %2155, %v1606_v39   ;;  %v3792_v28 = vmul.f32 %v2179_v11, %v3782_v22 }
 0x233   :  { %2184 = vrsqrt.f32 %v1575_v18  ;;  %v1540_v31 = vsub.f32 %v1504_v21, %v1522_v19  ;;  %v1523_v1 = vmul.f32 %v3789_v24, %v3789_v24 }
 0x234   :  { %v1457_v40 = vpop.xlane.xlu1 %1456  ;;  %v1353_v46 = vpop.xlane.xlu0 %1352  ;;  %v1626_v56 = vmul.f32 %v3792_v28, %v3727_v42 }
 0x235   :  { %v2181_v45 = vpop.eup %2180  ;;  %v1576_v39 = vadd.f32 1e-05, %v1540_v31  ;;  %v1505_v25 = vmul.f32 0.0051020407, %v1457_v40  ;;  %v3805_v61 = vmul.f32 0.0051020407, %v1353_v46 }
 0x236   :  { %1670 = vrot.lane.b32.xlu0 %v1626_v56, %s2232_s8  ;;  %1668 = vrot.lane.b32.xlu1 %v1625_v57, %s2232_s8  ;;  %v3810_v51 = vmul.f32 %v2181_v45, %v3797_v34  ;;  %v3828_v56 = vld [vmem:[%s4031_s3 + $0x58] sm:$0xff] }
 0x237   :  { %2186 = vrsqrt.f32 %v1576_v39  ;;  %v1541_v42 = vsub.f32 %v1505_v25, %v1523_v1  ;;  %v1524_v19 = vmul.f32 %v3805_v61, %v3805_v61 }
 0x238   :  { %v1461_v50 = vpop.xlane.xlu0 %1460  ;;  %v1357_v7 = vpop.xlane.xlu1 %1356  ;;  %v1627_v12 = vmul.f32 %v3810_v51, %v3738_v58 }
 0x239   :  { %v2183_v11 = vpop.eup %2182  ;;  %v1577_v18 = vadd.f32 1e-05, %v1541_v42  ;;  %v1506_v21 = vmul.f32 0.0051020407, %v1461_v50  ;;  %v1489_v31 = vmul.f32 0.0051020407, %v1357_v7 }
 0x23a   :  { %1672 = vrot.lane.b32.xlu1 %v1627_v12, %s2232_s8  ;;  %v3823_v40 = vmul.f32 %v2183_v11, %v3815_v6  ;;  %v3837_v11 = vld [vmem:[%s4031_s3 + $0x60] sm:$0xff] }
 0x23b   :  { %2188 = vrsqrt.f32 %v1577_v18  ;;  %v1542_v46 = vsub.f32 %v1506_v21, %v1524_v19  ;;  %v1525_v25 = vmul.f32 %v1489_v31, %v1489_v31 }
 0x23c   :  { %v1465_v58 = vpop.xlane.xlu1 %1464  ;;  %v1361_v57 = vpop.xlane.xlu0 %1360  ;;  %v1628_v45 = vmul.f32 %v3823_v40, %v3751_v17 }
 0x23d   :  { %v2185_v39 = vpop.eup %2184  ;;  %v1578_v1 = vadd.f32 1e-05, %v1542_v46  ;;  %v1507_v42 = vmul.f32 0.0051020407, %v1465_v58  ;;  %v1490_v50 = vmul.f32 0.0051020407, %v1361_v57 }
 0x23e   :  { %1674 = vrot.lane.b32.xlu0 %v1628_v45, %s2232_s8  ;;  %v1611_v7 = vmul.f32 %v2185_v39, %v3828_v56 }
 0x23f   :  { %2190 = vrsqrt.f32 %v1578_v1  ;;  %v1543_v12 = vsub.f32 %v1507_v42, %v1525_v25  ;;  %v1526_v60 = vmul.f32 %v1490_v50, %v1490_v50  ;;  %v3845_v1 = vld [vmem:[%s4031_s3 + $0x68] sm:$0xff] }
 0x240   :  { %v1469_v18 = vpop.xlane.xlu0 %1468  ;;  %v1365_v19 = vpop.xlane.xlu1 %1364  ;;  %v1629_v17 = vmul.f32 %v1611_v7, %v3763_v36 }
 0x241   :  { %v2187_v21 = vpop.eup %2186  ;;  %v1579_v46 = vadd.f32 1e-05, %v1543_v12  ;;  %v1508_v58 = vmul.f32 0.0051020407, %v1469_v18  ;;  %v1491_v57 = vmul.f32 0.0051020407, %v1365_v19 }
 0x242   :  { %1676 = vrot.lane.b32.xlu1 %v1629_v17, %s2232_s8  ;;  %v1612_v45 = vmul.f32 %v2187_v21, %v3837_v11 }
 0x243   :  { %2192 = vrsqrt.f32 %v1579_v46  ;;  %v1544_v39 = vsub.f32 %v1508_v58, %v1526_v60  ;;  %v1527_v12 = vmul.f32 %v1491_v57, %v1491_v57  ;;  %v3853_v60 = vld [vmem:[%s4031_s3 + $0x70] sm:$0xff]  ;;  %v3861_v58 = vld [vmem:[%s4031_s3 + $0x78] sm:$0xff] }
 0x244   :  { %v1473_v25 = vpop.xlane.xlu1 %1472  ;;  %v1630_v42 = vmul.f32 %v1612_v45, %v3775_v43 }
 0x245   :  { %v2189_v36 = vpop.eup %2188  ;;  %v1580_v44 = vadd.f32 1e-05, %v1544_v39  ;;  %v1509_v2 = vmul.f32 0.0051020407, %v1473_v25 }
 0x246   :  { %1678 = vrot.lane.b32.xlu0 %v1630_v42, %s2232_s8  ;;  %v1613_v18 = vmul.f32 %v2189_v36, %v3845_v1 }
 0x247   :  { %2194 = vrsqrt.f32 %v1580_v44  ;;  %v1545_v19 = vsub.f32 %v1509_v2, %v1527_v12 }
 0x248   :  { %v1631_v17 = vmul.f32 %v1613_v18, %v3789_v24  ;;  %v3869_v24 = vld [vmem:[%s4031_s3 + $0x80] sm:$0xff] }
 0x249   :  { %v2191_v21 = vpop.eup %2190  ;;  %v1581_v46 = vadd.f32 1e-05, %v1545_v19 }
 0x24a   :  { %1680 = vrot.lane.b32.xlu1 %v1631_v17, %s2232_s8  ;;  %v1614_v43 = vmul.f32 %v2191_v21, %v3853_v60 }
 0x24b   :  { %2196 = vrsqrt.f32 %v1581_v46 }
 0x24c   :  { %v1632_v44 = vmul.f32 %v1614_v43, %v3805_v61  ;;  %v3876_v61 = vld [vmem:[%s4031_s3 + $0x88] sm:$0xff]  ;;  %s2234_s3 = smov [#allocation2]  }
 0x24d   :  { %v2193_v2 = vpop.eup %2192 }
 0x24e   :  { %1682 = vrot.lane.b32.xlu0 %v1632_v44, %s2232_s8  ;;  %v1615_v39 = vmul.f32 %v2193_v2, %v3861_v58 }
 0x250   :  { %v1633_v25 = vmul.f32 %v1615_v39, %v1489_v31  ;;  %v2233_v31 = vmov 1  }
 0x251   :  { %v2195_v42 = vpop.eup %2194 }
 0x252   :  { %1684 = vrot.lane.b32.xlu1 %v1633_v25, %s2232_s8  ;;  %v1616_v36 = vmul.f32 %v2195_v42, %v3869_v24 }
 0x254   :  { %v1634_v12 = vmul.f32 %v1616_v36, %v1490_v50 }
 0x255   :  { %v2197_v19 = vpop.eup %2196 }
 0x256   :  { %1686 = vrot.lane.b32.xlu0 %v1634_v12, %s2232_s8  ;;  %v1617_v17 = vmul.f32 %v2197_v19, %v3876_v61 }
 0x258   :  { %v1635_v21 = vmul.f32 %v1617_v17, %v1491_v57 }
 0x25a   :  { %1763 = vperm.xlu0 %2154, %v3785_v15   ;;  %1688 = vrot.lane.b32.xlu1 %v1635_v21, %s2232_s8  ;;  %s2019_s8 = sshll.u32 %s2234_s3, 4  ;;  %s2020_s8 = int_to_ptr.vmem [resolvable:$true] %s2019_s8 }
 0x25b   :  { %s2207_s0 = scalar_lea.vmem %s2020_s8, 4608  ;;  %p2212_p1 = scmp.lt.s32.totalorder %s2020_s8, %s2020_s8 }
 0x25c   :  { %p2208_p0 = scmp.ne.s32.totalorder %s2020_s8, %s2207_s0  ;;  %p2213_p2 = scmp.lt.s32.totalorder %s2207_s0, %s2207_s0 }
 0x25e   :  { %1773 = vperm.xlu0 %2154, %v3810_v51   ;;  %1768 = vperm.xlu1 %2155, %v3792_v28   ;;  %p2214_p3 = por %p2213_p2, %p2212_p1 }
 0x260   :  { %p2215_p4 = pnand %p2214_p3, %p2208_p0 }
 0x262   :  { %1783 = vperm.xlu0 %2154, %v1611_v7   ;;  %1778 = vperm.xlu1 %2155, %v3823_v40  }
 0x266   :  { %1793 = vperm.xlu0 %2154, %v1613_v18   ;;  %1788 = vperm.xlu1 %2155, %v1612_v45  }
 0x26a   :  { %1803 = vperm.xlu0 %2154, %v1615_v39   ;;  %1798 = vperm.xlu1 %2155, %v1614_v43  }
 0x26e   :  { %1813 = vperm.xlu0 %2154, %v1617_v17   ;;  %1808 = vperm.xlu1 %2155, %v1616_v36  }
 0x272   :  { %2157 = vset.pattern.permute.xlu0 %v2233_v31  ;;  %2156 = vset.pattern.permute.xlu1 %v2233_v31 }
 0x295   :  { %v3885_v50 = vpop.permute.xlu1 %1733 }
 0x297   :  { %v3887_v15 = vpop.permute.xlu0 %1728 }
 0x299   :  { %v1657_v57 = vpop.permute.xlu1 %1656 }
 0x29a   :  { %v1709_v51 = vsub.f32 %v3690_v13, %v1657_v57 }
 0x29b   :  { %v1655_v28 = vpop.permute.xlu0 %1654 }
 0x29c   :  { %v1708_v7 = vsub.f32 %v3699_v30, %v1655_v28  ;;  %1859 = vperm.xlu0 %2157, %v1709_v51  }
 0x29d   :  { %v3891_v40 = vpop.permute.xlu1 %1738 }
 0x29e   :  { %1854 = vperm.xlu1 %2156, %v1708_v7  }
 0x29f   :  { %v3893_v45 = vpop.permute.xlu0 %1743 }
 0x2a1   :  { %v1659_v18 = vpop.permute.xlu1 %1658 }
 0x2a2   :  { %v1710_v46 = vsub.f32 %v3710_v63, %v1659_v18 }
 0x2a3   :  { %v1663_v43 = vpop.permute.xlu0 %1662 }
 0x2a4   :  { %v1712_v44 = vsub.f32 %v3733_v32, %v1663_v43  ;;  %1864 = vperm.xlu1 %2156, %v1710_v46  }
 0x2a5   :  { %v1661_v2 = vpop.permute.xlu1 %1660 }
 0x2a6   :  { %v1711_v39 = vsub.f32 %v3721_v53, %v1661_v2  ;;  %1874 = vperm.xlu0 %2157, %v1712_v44  }
 0x2a8   :  { %1869 = vperm.xlu1 %2156, %v1711_v39  }
 0x2a9   :  { %v3898_v13 = vpop.permute.xlu0 %1753  ;;  %v3900_v30 = vpop.permute.xlu1 %1748 }
 0x2ad   :  { %v1667_v25 = vpop.permute.xlu0 %1666  ;;  %v1665_v42 = vpop.permute.xlu1 %1664 }
 0x2ae   :  { %v1714_v36 = vsub.f32 %v3758_v52, %v1667_v25  ;;  %v1713_v12 = vsub.f32 %v3747_v41, %v1665_v42 }
 0x2b0   :  { %1884 = vperm.xlu0 %2157, %v1714_v36   ;;  %1879 = vperm.xlu1 %2156, %v1713_v12  }
 0x2b1   :  { %v1671_v63 = vpop.permute.xlu0 %1670  ;;  %v3904_v32 = vpop.permute.xlu1 %1758 }
 0x2b2   :  { %v1716_v19 = vsub.f32 %v3782_v22, %v1671_v63  ;;  %v1818_v63 = vmul.f32 %v3486_v10, %v3885_v50  ;;  %v1820_v10 = vmul.f32 %v3490_v14, %v3891_v40 }
 0x2b4   :  { %1894 = vperm.xlu0 %2157, %v1716_v19   ;;  %v2198_v19 = vld [vmem:[#allocation2 + $0x18] sm:$0xff] }
 0x2b5   :  { %v1675_v53 = vpop.permute.xlu0 %1674  ;;  %v1669_v17 = vpop.permute.xlu1 %1668 }
 0x2b6   :  { %v1718_v21 = vsub.f32 %v3815_v6, %v1675_v53  ;;  %v1715_v31 = vsub.f32 %v3771_v0, %v1669_v17  ;;  %v1819_v53 = vmul.f32 %v2198_v19, %v3885_v50  ;;  %v2200_v50 = vld [vmem:[#allocation2 + $0x28] sm:$0xff]  ;;  %v1828_v19 = vmul.f32 %v3518_v26, %v3904_v32 }
 0x2b8   :  { %1904 = vperm.xlu0 %2157, %v1718_v21   ;;  %1889 = vperm.xlu1 %2156, %v1715_v31   ;;  %v1816_v21 = vmul.f32 %v3484_v5, %v3887_v15  ;;  %v2199_v31 = vld [vmem:[#allocation2 + $0x8] sm:$0xff]  ;;  %v1821_v5 = vmul.f32 %v2200_v50, %v3891_v40 }
 0x2b9   :  { %v1679_v57 = vpop.permute.xlu0 %1678  ;;  %v1673_v52 = vpop.permute.xlu1 %1672 }
 0x2ba   :  { %v1720_v41 = vsub.f32 %v3837_v11, %v1679_v57  ;;  %v1717_v51 = vsub.f32 %v3797_v34, %v1673_v52  ;;  %v1817_v57 = vmul.f32 %v2199_v31, %v3887_v15  ;;  %v1824_v15 = vmul.f32 %v3502_v35, %v3900_v30 }
 0x2bc   :  { %1914 = vperm.xlu0 %2157, %v1720_v41   ;;  %1899 = vperm.xlu1 %2156, %v1717_v51  }
 0x2bd   :  { %v1677_v28 = vpop.permute.xlu1 %1676 }
 0x2be   :  { %v1719_v22 = vsub.f32 %v3828_v56, %v1677_v28 }
 0x2c0   :  { %v1683_v7 = vpop.permute.xlu0 %1682  ;;  %1909 = vperm.xlu1 %2156, %v1719_v22  }
 0x2c1   :  { %v1722_v18 = vsub.f32 %v3853_v60, %v1683_v7  ;;  %v1681_v6 = vpop.permute.xlu1 %1680 }
 0x2c2   :  { %v1721_v0 = vsub.f32 %v3845_v1, %v1681_v6 }
 0x2c3   :  { %1924 = vperm.xlu0 %2157, %v1722_v18   ;;  %v2201_v18 = vld [vmem:[#allocation2 + $0x48] sm:$0xff] }
 0x2c4   :  { %1919 = vperm.xlu1 %2156, %v1721_v0   ;;  %v1825_v6 = vmul.f32 %v2201_v18, %v3900_v30 }
 0x2c5   :  { %v1685_v46 = vpop.permute.xlu1 %1684 }
 0x2c6   :  { %v1723_v43 = vsub.f32 %v3861_v58, %v1685_v46 }
 0x2c8   :  { %v1687_v11 = vpop.permute.xlu0 %1686  ;;  %1929 = vperm.xlu1 %2156, %v1723_v43  }
 0x2c9   :  { %v1724_v34 = vsub.f32 %v3869_v24, %v1687_v11  ;;  %v1822_v11 = vmul.f32 %v3492_v20, %v3893_v45  ;;  %v1826_v20 = vmul.f32 %v3506_v49, %v3898_v13 }
 0x2cb   :  { %1934 = vperm.xlu0 %2157, %v1724_v34   ;;  %v2202_v34 = vld [vmem:[#allocation2 + $0x38] sm:$0xff] }
 0x2cc   :  { %v1689_v44 = vpop.permute.xlu1 %1688 }
 0x2cd   :  { %v1725_v56 = vsub.f32 %v3876_v61, %v1689_v44  ;;  %v1823_v44 = vmul.f32 %v2202_v34, %v3893_v45 }
 0x2cf   :  { %1939 = vperm.xlu1 %2156, %v1725_v56  }
 0x2d9   :  { %v3917_v2 = vpop.permute.xlu0 %1763 }
 0x2dd   :  { %v3919_v60 = vpop.permute.xlu0 %1773  ;;  %v1769_v39 = vpop.permute.xlu1 %1768 }
 0x2e1   :  { %v3921_v1 = vpop.permute.xlu0 %1783  ;;  %v3923_v25 = vpop.permute.xlu1 %1778 }
 0x2e5   :  { %v3925_v42 = vpop.permute.xlu0 %1793  ;;  %v3927_v58 = vpop.permute.xlu1 %1788 }
 0x2e9   :  { %v3929_v36 = vpop.permute.xlu0 %1803  ;;  %v3931_v24 = vpop.permute.xlu1 %1798 }
 0x2ed   :  { %v3933_v12 = vpop.permute.xlu0 %1813  ;;  %v3935_v61 = vpop.permute.xlu1 %1808 }
 0x31b   :  { %v1860_v17 = vpop.permute.xlu0 %1859 }
 0x31c   :  { %v1944_v52 = vadd.f32 %v1860_v17, %v1818_v63  ;;  %v1945_v41 = vadd.f32 %v1860_v17, %v1819_v53  ;;  %v2203_v63 = vld [vmem:[#allocation2 + $0x58] sm:$0xff]  ;;  %v2204_v53 = vld [vmem:[#allocation2 + $0x68] sm:$0xff] }
 0x31d   :  { %v1855_v51 = vpop.permute.xlu1 %1854  ;;  %v1827_v45 = vmul.f32 %v2203_v63, %v3898_v13  ;;  %v1829_v17 = vmul.f32 %v2204_v53, %v3904_v32  ;;  %v1830_v32 = vmul.f32 %v3522_v9, %v3917_v2  ;;  %v1834_v9 = vmul.f32 %v3538_v37, %v3919_v60 }
 0x31e   :  { %1980 = vst [vmem:[#allocation2 + $0x10] sm:$0xff] %v1944_v52  ;;  %1981 = vst.msk [vmem:[#allocation2 + $0x18] sm:$0xff] %vm1222_vm1, %v1945_v41  ;;  %v1942_v28 = vadd.f32 %v1855_v51, %v1816_v21  ;;  %v1943_v22 = vadd.f32 %v1855_v51, %v1817_v57 }
 0x320   :  { %1978 = vst [vmem:[#allocation2] sm:$0xff] %v1942_v28  ;;  %1979 = vst.msk [vmem:[#allocation2 + $0x8] sm:$0xff] %vm1222_vm1, %v1943_v22  ;;  %v1832_v28 = vmul.f32 %v3534_v29, %v1769_v39  ;;  %v1833_v22 = vmul.f32 %v1769_v39, %v3558_v8  ;;  %v1836_v29 = vmul.f32 %v3550_v48, %v3923_v25 }
 0x321   :  { %v1837_v8 = vmul.f32 %v3923_v25, %v3579_v38  ;;  %v1840_v48 = vmul.f32 %v3571_v23, %v3927_v58  ;;  %v1841_v38 = vmul.f32 %v3927_v58, %v3605_v54  ;;  %v1839_v23 = vmul.f32 %v3921_v1, %v3587_v55 }
 0x322   :  { %v1843_v55 = vmul.f32 %v3925_v42, %v3613_v16 }
 0x323   :  { %v1865_v7 = vpop.permute.xlu1 %1864 }
 0x324   :  { %v1946_v0 = vadd.f32 %v1865_v7, %v1820_v10  ;;  %v1947_v46 = vadd.f32 %v1865_v7, %v1821_v5  ;;  %v2205_v10 = vld [vmem:[#allocation2 + $0x78] sm:$0xff] }
 0x325   :  { %v1875_v43 = vpop.permute.xlu0 %1874  ;;  %v1831_v50 = vmul.f32 %v2205_v10, %v3917_v2 }
 0x326   :  { %1982 = vst [vmem:[#allocation2 + $0x20] sm:$0xff] %v1946_v0  ;;  %1983 = vst.msk [vmem:[#allocation2 + $0x28] sm:$0xff] %vm1222_vm1, %v1947_v46  ;;  %v1950_v14 = vadd.f32 %v1875_v43, %v1824_v15  ;;  %v1951_v40 = vadd.f32 %v1875_v43, %v1825_v6  ;;  %v2206_v0 = vld [vmem:[#allocation2 + $0x98] sm:$0xff] }
 0x327   :  { %v1870_v56 = vpop.permute.xlu1 %1869  ;;  %v1835_v2 = vmul.f32 %v2206_v0, %v3919_v60  ;;  %v1838_v60 = vmul.f32 %v3554_v4, %v3921_v1  ;;  %v1842_v4 = vmul.f32 %v3575_v33, %v3925_v42  ;;  %v1847_v33 = vmul.f32 %v3929_v36, %v3639_v59  ;;  %v4040_v59 = vld [vmem:[#allocation5_spill] sm:$0xff] }
 0x328   :  { %1986 = vst [vmem:[#allocation2 + $0x40] sm:$0xff] %v1950_v14  ;;  %1987 = vst.msk [vmem:[#allocation2 + $0x48] sm:$0xff] %vm1222_vm1, %v1951_v40  ;;  %v1948_v35 = vadd.f32 %v1870_v56, %v1822_v11  ;;  %v1949_v30 = vadd.f32 %v1870_v56, %v1823_v44  ;;  %v1844_v14 = vmul.f32 %v3597_v62, %v3931_v24 }
 0x329   :  { %v1845_v40 = vmul.f32 %v3931_v24, %v3631_v47  ;;  %v1846_v62 = vmul.f32 %v3601_v3, %v3929_v36  ;;  %v1848_v24 = vmul.f32 %v3623_v27, %v3935_v61  ;;  %v1850_v36 = vmul.f32 %v4040_v59, %v3933_v12 }
 0x32a   :  { %1984 = vst [vmem:[#allocation2 + $0x30] sm:$0xff] %v1948_v35  ;;  %1985 = vst.msk [vmem:[#allocation2 + $0x38] sm:$0xff] %vm1222_vm1, %v1949_v30 }
 0x32f   :  { %v1885_v21 = vpop.permute.xlu0 %1884  ;;  %v1880_v31 = vpop.permute.xlu1 %1879 }
 0x330   :  { %v1954_v57 = vadd.f32 %v1885_v21, %v1828_v19  ;;  %v1955_v52 = vadd.f32 %v1885_v21, %v1829_v17  ;;  %v1952_v41 = vadd.f32 %v1880_v31, %v1826_v20  ;;  %v1953_v51 = vadd.f32 %v1880_v31, %v1827_v45  ;;  %v4039_v45 = vld [vmem:[#allocation6_spill] sm:$0xff]  ;;  %v4041_v21 = vld [vmem:[#allocation7_spill] sm:$0xff] }
 0x331   :  { %v1849_v19 = vmul.f32 %v3935_v61, %v4039_v45  ;;  %v1851_v31 = vmul.f32 %v3933_v12, %v4041_v21 }
 0x332   :  { %1990 = vst [vmem:[#allocation2 + $0x60] sm:$0xff] %v1954_v57  ;;  %1991 = vst.msk [vmem:[#allocation2 + $0x68] sm:$0xff] %vm1222_vm1, %v1955_v52 }
 0x333   :  { %1988 = vst [vmem:[#allocation2 + $0x50] sm:$0xff] %v1952_v41  ;;  %1989 = vst.msk [vmem:[#allocation2 + $0x58] sm:$0xff] %vm1222_vm1, %v1953_v51  ;;  %v1895_v49 = vpop.permute.xlu0 %1894 }
 0x334   :  { %v1958_v26 = vadd.f32 %v1895_v49, %v1832_v28  ;;  %v1959_v13 = vadd.f32 %v1895_v49, %v1833_v22 }
 0x336   :  { %1994 = vst [vmem:[#allocation2 + $0x80] sm:$0xff] %v1958_v26  ;;  %1995 = vst.msk [vmem:[#allocation2 + $0x88] sm:$0xff] %vm1222_vm1, %v1959_v13 }
 0x337   :  { %v1905_v39 = vpop.permute.xlu0 %1904  ;;  %v1890_v5 = vpop.permute.xlu1 %1889 }
 0x338   :  { %v1962_v7 = vadd.f32 %v1905_v39, %v1836_v29  ;;  %v1963_v15 = vadd.f32 %v1905_v39, %v1837_v8  ;;  %v1956_v18 = vadd.f32 %v1890_v5, %v1830_v32  ;;  %v1957_v6 = vadd.f32 %v1890_v5, %v1831_v50 }
 0x33a   :  { %1998 = vst [vmem:[#allocation2 + $0xa0] sm:$0xff] %v1962_v7  ;;  %1999 = vst.msk [vmem:[#allocation2 + $0xa8] sm:$0xff] %vm1222_vm1, %v1963_v15 }
 0x33b   :  { %1992 = vst [vmem:[#allocation2 + $0x70] sm:$0xff] %v1956_v18  ;;  %1993 = vst.msk [vmem:[#allocation2 + $0x78] sm:$0xff] %vm1222_vm1, %v1957_v6  ;;  %v1915_v25 = vpop.permute.xlu0 %1914  ;;  %v1900_v46 = vpop.permute.xlu1 %1899 }
 0x33c   :  { %v1966_v43 = vadd.f32 %v1915_v25, %v1840_v48  ;;  %v1967_v11 = vadd.f32 %v1915_v25, %v1841_v38  ;;  %v1960_v37 = vadd.f32 %v1900_v46, %v1834_v9  ;;  %v1961_v34 = vadd.f32 %v1900_v46, %v1835_v2 }
 0x33e   :  { %2002 = vst [vmem:[#allocation2 + $0xc0] sm:$0xff] %v1966_v43  ;;  %2003 = vst.msk [vmem:[#allocation2 + $0xc8] sm:$0xff] %vm1222_vm1, %v1967_v11 }
 0x33f   :  { %1996 = vst [vmem:[#allocation2 + $0x90] sm:$0xff] %v1960_v37  ;;  %1997 = vst.msk [vmem:[#allocation2 + $0x98] sm:$0xff] %vm1222_vm1, %v1961_v34  ;;  %v1910_v54 = vpop.permute.xlu1 %1909 }
 0x340   :  { %v1964_v58 = vadd.f32 %v1910_v54, %v1838_v60  ;;  %v1965_v44 = vadd.f32 %v1910_v54, %v1839_v23 }
 0x342   :  { %2000 = vst [vmem:[#allocation2 + $0xb0] sm:$0xff] %v1964_v58  ;;  %2001 = vst.msk [vmem:[#allocation2 + $0xb8] sm:$0xff] %vm1222_vm1, %v1965_v44  ;;  %v1925_v1 = vpop.permute.xlu0 %1924 }
 0x343   :  { %v1970_v56 = vadd.f32 %v1925_v1, %v1844_v14  ;;  %v1971_v35 = vadd.f32 %v1925_v1, %v1845_v40  ;;  %v1920_v30 = vpop.permute.xlu1 %1919 }
 0x344   :  { %v1968_v20 = vadd.f32 %v1920_v30, %v1842_v4  ;;  %v1969_v63 = vadd.f32 %v1920_v30, %v1843_v55 }
 0x345   :  { %2006 = vst [vmem:[#allocation2 + $0xe0] sm:$0xff] %v1970_v56  ;;  %2007 = vst.msk [vmem:[#allocation2 + $0xe8] sm:$0xff] %vm1222_vm1, %v1971_v35 }
 0x346   :  { %2004 = vst [vmem:[#allocation2 + $0xd0] sm:$0xff] %v1968_v20  ;;  %2005 = vst.msk [vmem:[#allocation2 + $0xd8] sm:$0xff] %vm1222_vm1, %v1969_v63 }
 0x347   :  { %v1930_v16 = vpop.permute.xlu1 %1929 }
 0x348   :  { %v1972_v47 = vadd.f32 %v1930_v16, %v1846_v62  ;;  %v1973_v42 = vadd.f32 %v1930_v16, %v1847_v33 }
 0x34a   :  { %2008 = vst [vmem:[#allocation2 + $0xf0] sm:$0xff] %v1972_v47  ;;  %2009 = vst.msk [vmem:[#allocation2 + $0xf8] sm:$0xff] %vm1222_vm1, %v1973_v42  ;;  %v1935_v53 = vpop.permute.xlu0 %1934 }
 0x34b   :  { %v1974_v3 = vadd.f32 %v1935_v53, %v1848_v24  ;;  %v1975_v17 = vadd.f32 %v1935_v53, %v1849_v19 }
 0x34d   :  { %2010 = vst [vmem:[#allocation2 + $0x100] sm:$0xff] %v1974_v3  ;;  %2011 = vst.msk [vmem:[#allocation2 + $0x108] sm:$0xff] %vm1222_vm1, %v1975_v17 }
 0x34e   :  { %v1940_v27 = vpop.permute.xlu1 %1939 }
 0x34f   :  { %v1976_v61 = vadd.f32 %v1940_v27, %v1850_v36  ;;  %v1977_v57 = vadd.f32 %v1940_v27, %v1851_v31 }
 0x351   :  { %2012 = vst [vmem:[#allocation2 + $0x110] sm:$0xff] %v1976_v61  ;;  %2013 = vst.msk [vmem:[#allocation2 + $0x118] sm:$0xff] %vm1222_vm1, %v1977_v57 }
 0x352   :  { %2218 = shalt.err (!%p2215_p4)
}
 0x353   :  { %s2219_s12 = scalar_lea.hbm %s4032_s4, 4608 }
 0x354   :  { %p2220_p5 = scmp.ne.s32.totalorder %s4032_s4, %s2219_s12  ;;  %p2223_p6 = scmp.lt.u32.totalorder %s2219_s12, %s4032_s4 }
 0x356   :  { %p2225_p7 = pnand %p2223_p6, %p2220_p5 }
 0x358   :  { %2228 = shalt.err (!%p2225_p7)
}
 0x359   :  { %s2235_s17 = smov 256   ;;  %s2236_s18 = smov 16  }
 0x35a   :  { %2025 = dma.vmem_to_hbm [thread:$0]  %s2020_s8, 4608, %s4032_s4, [#allocation3], %s2235_s17, %s2235_s17, %s2236_s18  }
 0x35b   :  { %2229 = dma.done.wait [#allocation3], 4608  }
 0x35c   :  { %2230 = vsyncadd [#allocation3], 4294962688 }
 0x35d   :  { %2029 = vsyncpa [#allocation3], 1 }

</bundles_post_ra>
